<compile_context>
chip_gen: v7x
topology: tpu7x:2x2x1
jax: 0.10.0
libtpu: 0.0.40
codegen_flags: <defaults>
</compile_context>

<pallas_src>
import functools
import math

import jax
import jax.numpy as jnp
from jax.experimental import pallas as pl
from jax.experimental.pallas import tpu as pltpu


# ----------------------------- in-kernel helpers ---------------------------- #

def _layernorm(x, gamma, beta, eps):
    mu = jnp.mean(x, axis=-1, keepdims=True)
    xc = x - mu
    var = jnp.mean(xc * xc, axis=-1, keepdims=True)
    return xc * jax.lax.rsqrt(var + eps) * gamma + beta


def _gelu_tanh(x):
    return 0.5 * x * (1.0 + jnp.tanh(0.7978845608028654 * (x + 0.044715 * x * x * x)))


# ----------------------------- Pallas kernels ------------------------------ #

def embed_ln_kernel(x_ref, res_ref, g_ref, b_ref, o_ref, *, eps):
    # LayerNorm((word+pos) + token_type) over the last axis (BERT eps = 1e-12), bf16 out.
    y = _layernorm(x_ref[...] + res_ref[...], g_ref[...], b_ref[...], eps)
    o_ref[...] = y.astype(o_ref.dtype)


def encoder_layer_kernel(h_ref, bias_ref,
                         wqkv_ref, bqkv_ref, wo_ref, bo_ref,
                         ln1_g_ref, ln1_b_ref,
                         wi_ref, bi_ref, wf_ref, bf_ref,
                         ln2_g_ref, ln2_b_ref,
                         o_ref,
                         q_scr, k_scr, v_scr, ctx_scr,
                         *, tb, S, NH, Dh, eps):
    H = NH * Dh
    M = tb * S
    scale = 1.0 / math.sqrt(Dh)

    h_bf = h_ref[...]                                  # (M, H) bf16 hidden tile
    h_f32 = h_bf.astype(jnp.float32)

    # --- fused QKV projection: one bf16 MXU matmul, N = 3H ---
    qkv = jnp.dot(h_bf, wqkv_ref[...],
                  preferred_element_type=jnp.float32) + bqkv_ref[...]       # (M, 3H) f32
    q_all = qkv[:, :H] * scale                         # fold 1/sqrt(Dh) into q (M*H elems)
    k_all = qkv[:, H:2 * H]
    v_all = qkv[:, 2 * H:]

    # cheap static scatter into head-major VMEM scratch (bf16, feeds the MXU directly)
    for hh in range(NH):
        sl = slice(hh * Dh, (hh + 1) * Dh)
        q_scr[hh] = q_all[:, sl].reshape(tb, S, Dh).astype(jnp.bfloat16)
        k_scr[hh] = k_all[:, sl].reshape(tb, S, Dh).astype(jnp.bfloat16)
        v_scr[hh] = v_all[:, sl].reshape(tb, S, Dh).astype(jnp.bfloat16)

    # additive mask, broadcast hoisted out of the head loop
    bias_full = jnp.broadcast_to(bias_ref[...], (tb, S, S))                 # (tb, S, S) f32

    # --- attention: fori_loop over heads (bounded live ranges), writes ctx scratch ---
    def head_body(hd, carry):
        qh = q_scr[hd]                                                      # (tb, S, Dh) bf16
        kh = k_scr[hd]
        vh = v_scr[hd]
        s = jnp.einsum('bqd,bkd->bqk', qh, kh,
                       preferred_element_type=jnp.float32) + bias_full      # (tb, S, S) f32
        s = s - jnp.max(s, axis=-1, keepdims=True)
        p = jnp.exp(s)
        p = p * pl.reciprocal(jnp.sum(p, axis=-1, keepdims=True), approx=True)
        ctx_scr[hd] = jnp.einsum('bqk,bkd->bqd', p.astype(jnp.bfloat16), vh,
                                 preferred_element_type=jnp.float32
                                 ).astype(jnp.bfloat16)                     # (tb, S, Dh)
        return carry

    jax.lax.fori_loop(0, NH, head_body, 0)

    # --- out-projection without a lane concat:  sum_h ctx_h @ Wo[h*Dh:(h+1)*Dh]  ---
    attn = bo_ref[...].astype(jnp.float32)                                  # (1, H) -> bcast
    for hh in range(NH):
        attn = attn + jnp.dot(ctx_scr[hh].reshape(M, Dh),
                              wo_ref[hh * Dh:(hh + 1) * Dh, :],
                              preferred_element_type=jnp.float32)           # (M, H) f32

    h1 = _layernorm(attn + h_f32, ln1_g_ref[...], ln1_b_ref[...], eps)

    # --- FFN (up + GELU, down) + residual + LayerNorm ---
    inter = jnp.dot(h1.astype(jnp.bfloat16), wi_ref[...],
                    preferred_element_type=jnp.float32) + bi_ref[...]
    inter = _gelu_tanh(inter)
    ffn = jnp.dot(inter.astype(jnp.bfloat16), wf_ref[...],
                  preferred_element_type=jnp.float32) + bf_ref[...]
    o_ref[...] = _layernorm(ffn + h1, ln2_g_ref[...], ln2_b_ref[...], eps).astype(o_ref.dtype)


def tail_kernel(cls_ref, pw_ref, pb_ref, cw_ref, cb_ref, onehot_ref,
                logits_ref, loss_ref, *, num_labels):
    # pooler (tanh on [CLS]) + classifier (lane-padded) + mean softmax cross-entropy.
    pooled = jnp.tanh(jnp.dot(cls_ref[...], pw_ref[...],
                              preferred_element_type=jnp.float32) + pb_ref[...])
    logits = jnp.dot(pooled.astype(jnp.bfloat16), cw_ref[...],
                     preferred_element_type=jnp.float32) + cb_ref[...]      # (B, Lp) f32
    logits_ref[...] = logits                          # lane-dense store; real cols sliced outside
    col = jax.lax.broadcasted_iota(jnp.int32, logits.shape, 1)
    masked = jnp.where(col < num_labels, logits, -1e30)                     # mask pad columns
    m = jnp.max(masked, axis=-1, keepdims=True)
    lse = jnp.log(jnp.sum(jnp.exp(masked - m), axis=-1, keepdims=True)) + m
    nll = jnp.sum(onehot_ref[...] * (lse - logits), axis=-1, keepdims=True)  # (B, 1)
    loss_ref[...] = jnp.mean(nll, keepdims=True)                             # (1, 1)


# ------------------------------ Pallas wrappers ----------------------------- #

def pallas_embed_ln(x, res, gamma, beta, eps=1e-12):
    M, H = x.shape
    return pl.pallas_call(
        functools.partial(embed_ln_kernel, eps=eps),
        out_shape=jax.ShapeDtypeStruct((M, H), jnp.bfloat16),
    )(x, res, gamma.reshape(1, H), beta.reshape(1, H))


def pallas_encoder_layer(hidden, bias, layer, *, B, S, NH, Dh, tb=1, eps=1e-12):
    H = NH * Dh
    I = layer["wi"].shape[1]
    Mt = tb * S
    assert B % tb == 0
    grid = (B // tb,)

    def resident(r, c):                         # weights: constant block -> stay VMEM-resident
        return pl.BlockSpec((r, c), lambda i: (0, 0))

    in_specs = [
        pl.BlockSpec((Mt, H), lambda i: (i, 0)),           # hidden tile (streams per batch tile)
        pl.BlockSpec((tb, 1, S), lambda i: (i, 0, 0)),     # additive mask tile
        resident(H, 3 * H), resident(1, 3 * H),            # wqkv, bqkv
        resident(H, H), resident(1, H),                    # wo, bo
        resident(1, H), resident(1, H),                    # ln1 gamma/beta
        resident(H, I), resident(1, I),                    # wi, bi
        resident(I, H), resident(1, H),                    # wf, bf
        resident(1, H), resident(1, H),                    # ln2 gamma/beta
    ]
    out_specs = pl.BlockSpec((Mt, H), lambda i: (i, 0))
    scratch = [
        pltpu.VMEM((NH, tb, S, Dh), jnp.bfloat16),         # q (head-major)
        pltpu.VMEM((NH, tb, S, Dh), jnp.bfloat16),         # k
        pltpu.VMEM((NH, tb, S, Dh), jnp.bfloat16),         # v
        pltpu.VMEM((NH, tb, S, Dh), jnp.bfloat16),         # per-head context
    ]
    return pl.pallas_call(
        functools.partial(encoder_layer_kernel, tb=tb, S=S, NH=NH, Dh=Dh, eps=eps),
        out_shape=jax.ShapeDtypeStruct((B * S, H), jnp.bfloat16),
        grid_spec=pltpu.PrefetchScalarGridSpec(
            num_scalar_prefetch=0, grid=grid,
            in_specs=in_specs, out_specs=out_specs, scratch_shapes=scratch),
        compiler_params=pltpu.CompilerParams(
            dimension_semantics=("parallel",),             # shards batch tiles across TCs on v7x
            vmem_limit_bytes=64 * 1024 * 1024),            # safe on v5e/v6e/v7x; above scoped defaults
    )(hidden, bias,
      layer["wqkv"], layer["bqkv"].reshape(1, 3 * H),
      layer["wo"], layer["bo"].reshape(1, H),
      layer["ln1_g"].reshape(1, H), layer["ln1_b"].reshape(1, H),
      layer["wi"], layer["bi"].reshape(1, I),
      layer["wf"], layer["bf"].reshape(1, H),
      layer["ln2_g"].reshape(1, H), layer["ln2_b"].reshape(1, H))


def pallas_tail(cls_tok, pool_w, pool_b, cls_w_pad, cls_b_pad, onehot, num_labels):
    B, H = cls_tok.shape
    Lp = cls_w_pad.shape[1]
    return pl.pallas_call(
        functools.partial(tail_kernel, num_labels=num_labels),
        out_shape=(jax.ShapeDtypeStruct((B, Lp), jnp.float32),
                   jax.ShapeDtypeStruct((1, 1), jnp.float32)),
    )(cls_tok, pool_w, pool_b.reshape(1, H), cls_w_pad, cls_b_pad.reshape(1, Lp), onehot)


# ------------------------------ Model (forward) ----------------------------- #

CFG = dict(
    vocab=128,          # synthetic vocab (real mBERT: ~119547)
    hidden=32,
    heads=4,
    layers=2,
    intermediate=64,
    max_pos=16,
    type_vocab=2,
    num_labels=3,
    batch_tile=1,       # per-grid-step batch tile (v7x: keep ~half of v6e/v5e at real shapes)
)


def init_params(key, cfg):
    n_keys = 5 + cfg["layers"] * 4
    keys = iter(jax.random.split(key, n_keys))

    def nrm(shape, dtype=jnp.float32):
        return (0.02 * jax.random.normal(next(keys), shape, jnp.float32)).astype(dtype)

    H, I, L = cfg["hidden"], cfg["intermediate"], cfg["num_labels"]
    Lp = max(128, ((L + 127) // 128) * 128)     # lane-dense classifier width

    params = dict(
        word_emb=nrm((cfg["vocab"], H)),
        pos_emb=nrm((cfg["max_pos"], H)),
        type_emb=nrm((cfg["type_vocab"], H)),
        emb_ln_g=jnp.ones((H,), jnp.float32),
        emb_ln_b=jnp.zeros((H,), jnp.float32),
        layers=[],
        pool_w=nrm((H, H), jnp.bfloat16),
        pool_b=jnp.zeros((H,), jnp.float32),
        cls_w=jnp.pad(nrm((H, L)), ((0, 0), (0, Lp - L))).astype(jnp.bfloat16),
        cls_b=jnp.zeros((Lp,), jnp.float32),
    )
    for _ in range(cfg["layers"]):
        params["layers"].append(dict(
            # fused Q|K|V weight (H, 3H), stored bf16 (bf16-in / f32-acc on the MXU)
            wqkv=nrm((H, 3 * H), jnp.bfloat16), bqkv=jnp.zeros((3 * H,), jnp.float32),
            wo=nrm((H, H), jnp.bfloat16), bo=jnp.zeros((H,), jnp.float32),
            ln1_g=jnp.ones((H,), jnp.float32), ln1_b=jnp.zeros((H,), jnp.float32),
            wi=nrm((H, I), jnp.bfloat16), bi=jnp.zeros((I,), jnp.float32),
            wf=nrm((I, H), jnp.bfloat16), bf=jnp.zeros((H,), jnp.float32),
            ln2_g=jnp.ones((H,), jnp.float32), ln2_b=jnp.zeros((H,), jnp.float32),
        ))
    return params


def mbert_forward(params, input_ids, attention_mask, token_type_ids, labels, cfg=CFG):
    B, S = input_ids.shape
    H, NH, L = cfg["hidden"], cfg["heads"], cfg["num_labels"]
    Dh = H // NH
    Lp = params["cls_w"].shape[1]
    tb = cfg["batch_tile"]

    # ---- embeddings (gathers are XLA glue; add + LayerNorm fused, bf16 out) ----
    word = jnp.take(params["word_emb"], input_ids, axis=0)               # (B, S, H)
    pos = params["pos_emb"][:S][None, :, :]                              # (1, S, H)
    typ = jnp.take(params["type_emb"], token_type_ids, axis=0)           # (B, S, H)
    x = (word + pos).reshape(B * S, H)
    res = typ.reshape(B * S, H)
    hidden = pallas_embed_ln(x, res, params["emb_ln_g"], params["emb_ln_b"])   # bf16
    # dropout: eval-mode identity

    # extended attention mask: additive bias broadcast over heads / query rows
    bias = ((1.0 - attention_mask.astype(jnp.float32)) * -10000.0)[:, None, :]  # (B, 1, S)

    # ---- transformer encoder: ONE fused, batch-gridded pallas_call per layer ----
    for layer in params["layers"]:
        hidden = pallas_encoder_layer(hidden, bias, layer, B=B, S=S, NH=NH, Dh=Dh, tb=tb)

    # ---- pooler ([CLS]) + classifier + CE loss: ONE fused tail kernel ----
    cls_tok = hidden.reshape(B, S, H)[:, 0, :]                           # (B, H) bf16
    onehot = jax.nn.one_hot(labels, Lp, dtype=jnp.float32)               # padded one-hot
    logits_pad, loss = pallas_tail(cls_tok, params["pool_w"], params["pool_b"],
                                   params["cls_w"], params["cls_b"], onehot, L)
    return loss[0, 0], logits_pad[:, :L]


# ----------------------------------- main ----------------------------------- #

if __name__ == "__main__":
    key = jax.random.PRNGKey(0)
    k_param, k_ids, k_types, k_labels = jax.random.split(key, 4)

    B, S = 2, 8
    params = init_params(k_param, CFG)

    input_ids = jax.random.randint(k_ids, (B, S), 0, CFG["vocab"], dtype=jnp.int32)
    # mask out the last two tokens of the second example (padding)
    attention_mask = jnp.array(
        [[1, 1, 1, 1, 1, 1, 1, 1],
         [1, 1, 1, 1, 1, 1, 0, 0]], dtype=jnp.int32)
    token_type_ids = jax.random.randint(k_types, (B, S), 0, CFG["type_vocab"],
                                        dtype=jnp.int32)
    labels = jax.random.randint(k_labels, (B,), 0, CFG["num_labels"], dtype=jnp.int32)

    loss, logits = jax.jit(mbert_forward)(params, input_ids, attention_mask,
                                          token_type_ids, labels)
    jax.block_until_ready((loss, logits))
    assert logits.shape == (B, CFG["num_labels"])
    assert loss.shape == ()
    assert bool(jnp.isfinite(loss))
    print("KERNEL_OK")
</pallas_src>

<mosaic_0001>
module attributes {stable_mosaic.version = 11 : i64} {
  func.func @embed_ln_kernel(%arg0: memref<16x32xf32, #tpu.memory_space<vmem>>, %arg1: memref<16x32xf32, #tpu.memory_space<vmem>>, %arg2: memref<1x32xf32, #tpu.memory_space<vmem>>, %arg3: memref<1x32xf32, #tpu.memory_space<vmem>>, %arg4: memref<16x32xbf16, #tpu.memory_space<vmem>>) attributes {dimension_semantics = [], scalar_prefetch = 0 : i64, scratch_operands = 0 : i64, tpu.core_type = #tpu.core_type<tc>} {
    %c0 = arith.constant 0 : index
    %c0_0 = arith.constant 0 : index
    %0 = vector.load %arg0[%c0, %c0_0] : memref<16x32xf32, #tpu.memory_space<vmem>>, vector<16x32xf32>
    %c0_1 = arith.constant 0 : index
    %c0_2 = arith.constant 0 : index
    %1 = vector.load %arg1[%c0_1, %c0_2] : memref<16x32xf32, #tpu.memory_space<vmem>>, vector<16x32xf32>
    %2 = arith.addf %0, %1 : vector<16x32xf32>
    %c0_3 = arith.constant 0 : index
    %c0_4 = arith.constant 0 : index
    %3 = vector.load %arg2[%c0_3, %c0_4] : memref<1x32xf32, #tpu.memory_space<vmem>>, vector<1x32xf32>
    %c0_5 = arith.constant 0 : index
    %c0_6 = arith.constant 0 : index
    %4 = vector.load %arg3[%c0_5, %c0_6] : memref<1x32xf32, #tpu.memory_space<vmem>>, vector<1x32xf32>
    %cst = arith.constant dense<0.000000e+00> : vector<16xf32>
    %5 = vector.multi_reduction <add>, %2, %cst [1] : vector<16x32xf32> to vector<16xf32>
    %6 = vector.shape_cast %5 : vector<16xf32> to vector<16x1xf32>
    %cst_7 = arith.constant 3.200000e+01 : f32
    %7 = vector.broadcast %cst_7 : f32 to vector<16x1xf32>
    %8 = arith.divf %6, %7 : vector<16x1xf32>
    %9 = vector.broadcast %8 : vector<16x1xf32> to vector<16x32xf32>
    %10 = arith.subf %2, %9 : vector<16x32xf32>
    %11 = arith.mulf %10, %10 : vector<16x32xf32>
    %cst_8 = arith.constant dense<0.000000e+00> : vector<16xf32>
    %12 = vector.multi_reduction <add>, %11, %cst_8 [1] : vector<16x32xf32> to vector<16xf32>
    %13 = vector.shape_cast %12 : vector<16xf32> to vector<16x1xf32>
    %cst_9 = arith.constant 3.200000e+01 : f32
    %14 = vector.broadcast %cst_9 : f32 to vector<16x1xf32>
    %15 = arith.divf %13, %14 : vector<16x1xf32>
    %cst_10 = arith.constant 9.99999996E-13 : f32
    %16 = vector.broadcast %cst_10 : f32 to vector<16x1xf32>
    %17 = arith.addf %15, %16 : vector<16x1xf32>
    %18 = math.rsqrt %17 : vector<16x1xf32>
    %19 = vector.broadcast %18 : vector<16x1xf32> to vector<16x32xf32>
    %20 = arith.mulf %10, %19 : vector<16x32xf32>
    %21 = vector.broadcast %3 : vector<1x32xf32> to vector<16x32xf32>
    %22 = arith.mulf %20, %21 : vector<16x32xf32>
    %23 = vector.broadcast %4 : vector<1x32xf32> to vector<16x32xf32>
    %24 = arith.addf %22, %23 : vector<16x32xf32>
    %25 = arith.truncf %24 : vector<16x32xf32> to vector<16x32xbf16>
    %c0_11 = arith.constant 0 : index
    %c0_12 = arith.constant 0 : index
    %26 = vector.load %arg4[%c0_11, %c0_12] : memref<16x32xbf16, #tpu.memory_space<vmem>>, vector<16x32xbf16>
    tpu.vector_store %arg4[%c0_11, %c0_12], %25 {strides = array<i32>} : memref<16x32xbf16, #tpu.memory_space<vmem>>, vector<16x32xbf16>,
    return
  }
}

module attributes {stable_mosaic.version = 11 : i64} {
  func.func @tail_kernel(%arg0: memref<2x32xbf16, #tpu.memory_space<vmem>>, %arg1: memref<32x32xbf16, #tpu.memory_space<vmem>>, %arg2: memref<1x32xf32, #tpu.memory_space<vmem>>, %arg3: memref<32x128xbf16, #tpu.memory_space<vmem>>, %arg4: memref<1x128xf32, #tpu.memory_space<vmem>>, %arg5: memref<2x128xf32, #tpu.memory_space<vmem>>, %arg6: memref<2x128xf32, #tpu.memory_space<vmem>>, %arg7: memref<1x1xf32, #tpu.memory_space<vmem>>) attributes {dimension_semantics = [], scalar_prefetch = 0 : i64, scratch_operands = 0 : i64, tpu.core_type = #tpu.core_type<tc>} {
    %c0 = arith.constant 0 : index
    %c0_0 = arith.constant 0 : index
    %0 = vector.load %arg0[%c0, %c0_0] : memref<2x32xbf16, #tpu.memory_space<vmem>>, vector<2x32xbf16>
    %c0_1 = arith.constant 0 : index
    %c0_2 = arith.constant 0 : index
    %1 = vector.load %arg1[%c0_1, %c0_2] : memref<32x32xbf16, #tpu.memory_space<vmem>>, vector<32x32xbf16>
    %cst = arith.constant dense<0.000000e+00> : vector<2x32xf32>
    %2 = tpu.matmul %0, %1, %cst {dimension_numbers = #tpu.dot_dimension_numbers<[1], [0], [0], [1], [0, 0, 1, 1], [], []>} : vector<2x32xbf16>, vector<32x32xbf16>, vector<2x32xf32> -> vector<2x32xf32>
    %c0_3 = arith.constant 0 : index
    %c0_4 = arith.constant 0 : index
    %3 = vector.load %arg2[%c0_3, %c0_4] : memref<1x32xf32, #tpu.memory_space<vmem>>, vector<1x32xf32>
    %4 = vector.broadcast %3 : vector<1x32xf32> to vector<2x32xf32>
    %5 = arith.addf %2, %4 : vector<2x32xf32>
    %6 = math.tanh %5 : vector<2x32xf32>
    %7 = arith.truncf %6 : vector<2x32xf32> to vector<2x32xbf16>
    %c0_5 = arith.constant 0 : index
    %c0_6 = arith.constant 0 : index
    %8 = vector.load %arg3[%c0_5, %c0_6] : memref<32x128xbf16, #tpu.memory_space<vmem>>, vector<32x128xbf16>
    %cst_7 = arith.constant dense<0.000000e+00> : vector<2x128xf32>
    %9 = tpu.matmul %7, %8, %cst_7 {dimension_numbers = #tpu.dot_dimension_numbers<[1], [0], [0], [1], [0, 0, 1, 1], [], []>} : vector<2x32xbf16>, vector<32x128xbf16>, vector<2x128xf32> -> vector<2x128xf32>
    %c0_8 = arith.constant 0 : index
    %c0_9 = arith.constant 0 : index
    %10 = vector.load %arg4[%c0_8, %c0_9] : memref<1x128xf32, #tpu.memory_space<vmem>>, vector<1x128xf32>
    %11 = vector.broadcast %10 : vector<1x128xf32> to vector<2x128xf32>
    %12 = arith.addf %9, %11 : vector<2x128xf32>
    %c0_10 = arith.constant 0 : index
    %c0_11 = arith.constant 0 : index
    %13 = vector.load %arg6[%c0_10, %c0_11] : memref<2x128xf32, #tpu.memory_space<vmem>>, vector<2x128xf32>
    tpu.vector_store %arg6[%c0_10, %c0_11], %12 {strides = array<i32>} : memref<2x128xf32, #tpu.memory_space<vmem>>, vector<2x128xf32>,
    %14 = tpu.iota {dimensions = array<i32: 1>} : vector<2x128xi32>
    %c3_i32 = arith.constant 3 : i32
    %15 = vector.broadcast %c3_i32 : i32 to vector<2x128xi32>
    %16 = arith.cmpi slt, %14, %15 : vector<2x128xi32>
    %cst_12 = arith.constant -1.000000e+30 : f32
    %17 = vector.broadcast %cst_12 : f32 to vector<2x128xf32>
    %18 = arith.select %16, %12, %17 : vector<2x128xi1>, vector<2x128xf32>
    %cst_13 = arith.constant dense<0xFF800000> : vector<2xf32>
    %19 = vector.multi_reduction <maximumf>, %18, %cst_13 [1] : vector<2x128xf32> to vector<2xf32>
    %20 = vector.shape_cast %19 : vector<2xf32> to vector<2x1xf32>
    %21 = vector.broadcast %20 : vector<2x1xf32> to vector<2x128xf32>
    %22 = arith.subf %18, %21 : vector<2x128xf32>
    %23 = math.exp %22 : vector<2x128xf32>
    %cst_14 = arith.constant dense<0.000000e+00> : vector<2xf32>
    %24 = vector.multi_reduction <add>, %23, %cst_14 [1] : vector<2x128xf32> to vector<2xf32>
    %25 = vector.shape_cast %24 : vector<2xf32> to vector<2x1xf32>
    %26 = math.log %25 : vector<2x1xf32>
    %27 = arith.addf %26, %20 : vector<2x1xf32>
    %c0_15 = arith.constant 0 : index
    %c0_16 = arith.constant 0 : index
    %28 = vector.load %arg5[%c0_15, %c0_16] : memref<2x128xf32, #tpu.memory_space<vmem>>, vector<2x128xf32>
    %29 = vector.broadcast %27 : vector<2x1xf32> to vector<2x128xf32>
    %30 = arith.subf %29, %12 : vector<2x128xf32>
    %31 = arith.mulf %28, %30 : vector<2x128xf32>
    %cst_17 = arith.constant dense<0.000000e+00> : vector<2xf32>
    %32 = vector.multi_reduction <add>, %31, %cst_17 [1] : vector<2x128xf32> to vector<2xf32>
    %33 = vector.shape_cast %32 : vector<2xf32> to vector<2x1xf32>
    %34 = vector.shape_cast %33 : vector<2x1xf32> to vector<1x2x1xf32>
    %cst_18 = arith.constant dense<0.000000e+00> : vector<1xf32>
    %35 = vector.multi_reduction <add>, %34, %cst_18 [1, 2] : vector<1x2x1xf32> to vector<1xf32>
    %36 = vector.shape_cast %35 : vector<1xf32> to vector<1x1x1xf32>
    %37 = vector.extract %36[0, 0, 0] : f32 from vector<1x1x1xf32>
    %38 = vector.broadcast %37 : f32 to vector<1x1xf32>
    %cst_19 = arith.constant 2.000000e+00 : f32
    %39 = vector.broadcast %cst_19 : f32 to vector<1x1xf32>
    %40 = arith.divf %38, %39 : vector<1x1xf32>
    %c0_20 = arith.constant 0 : index
    %c0_21 = arith.constant 0 : index
    %41 = vector.load %arg7[%c0_20, %c0_21] : memref<1x1xf32, #tpu.memory_space<vmem>>, vector<1x1xf32>
    tpu.vector_store %arg7[%c0_20, %c0_21], %40 {strides = array<i32>} : memref<1x1xf32, #tpu.memory_space<vmem>>, vector<1x1xf32>,
    return
  }
}

module attributes {stable_mosaic.version = 11 : i64} {
  func.func @encoder_layer_kernel(%arg0: i32, %arg1: memref<8x32xbf16, #tpu.memory_space<vmem>>, %arg2: memref<1x1x8xf32, #tpu.memory_space<vmem>>, %arg3: memref<32x96xbf16, #tpu.memory_space<vmem>>, %arg4: memref<1x96xf32, #tpu.memory_space<vmem>>, %arg5: memref<32x32xbf16, #tpu.memory_space<vmem>>, %arg6: memref<1x32xf32, #tpu.memory_space<vmem>>, %arg7: memref<1x32xf32, #tpu.memory_space<vmem>>, %arg8: memref<1x32xf32, #tpu.memory_space<vmem>>, %arg9: memref<32x64xbf16, #tpu.memory_space<vmem>>, %arg10: memref<1x64xf32, #tpu.memory_space<vmem>>, %arg11: memref<64x32xbf16, #tpu.memory_space<vmem>>, %arg12: memref<1x32xf32, #tpu.memory_space<vmem>>, %arg13: memref<1x32xf32, #tpu.memory_space<vmem>>, %arg14: memref<1x32xf32, #tpu.memory_space<vmem>>, %arg15: memref<8x32xbf16, #tpu.memory_space<vmem>>, %arg16: memref<4x1x8x8xbf16, #tpu.memory_space<vmem>>, %arg17: memref<4x1x8x8xbf16, #tpu.memory_space<vmem>>, %arg18: memref<4x1x8x8xbf16, #tpu.memory_space<vmem>>, %arg19: memref<4x1x8x8xbf16, #tpu.memory_space<vmem>>) attributes {dimension_semantics = [#tpu.dimension_semantics<parallel>], iteration_bounds = array<i64: 2>, scalar_prefetch = 0 : i64, scratch_operands = 4 : i64, tpu.core_type = #tpu.core_type<tc>, window_params = [{transform_indices = @transform_0, window_bounds = array<i64: 8, 32>}, {transform_indices = @transform_1, window_bounds = array<i64: 1, 1, 8>}, {pipeline_mode = #tpu.pipeline_mode<synchronous>, transform_indices = @transform_2, window_bounds = array<i64: 32, 96>}, {pipeline_mode = #tpu.pipeline_mode<synchronous>, transform_indices = @transform_3, window_bounds = array<i64: 1, 96>}, {pipeline_mode = #tpu.pipeline_mode<synchronous>, transform_indices = @transform_4, window_bounds = array<i64: 32, 32>}, {pipeline_mode = #tpu.pipeline_mode<synchronous>, transform_indices = @transform_5, window_bounds = array<i64: 1, 32>}, {pipeline_mode = #tpu.pipeline_mode<synchronous>, transform_indices = @transform_6, window_bounds = array<i64: 1, 32>}, {pipeline_mode = #tpu.pipeline_mode<synchronous>, transform_indices = @transform_7, window_bounds = array<i64: 1, 32>}, {pipeline_mode = #tpu.pipeline_mode<synchronous>, transform_indices = @transform_8, window_bounds = array<i64: 32, 64>}, {pipeline_mode = #tpu.pipeline_mode<synchronous>, transform_indices = @transform_9, window_bounds = array<i64: 1, 64>}, {pipeline_mode = #tpu.pipeline_mode<synchronous>, transform_indices = @transform_10, window_bounds = array<i64: 64, 32>}, {pipeline_mode = #tpu.pipeline_mode<synchronous>, transform_indices = @transform_11, window_bounds = array<i64: 1, 32>}, {pipeline_mode = #tpu.pipeline_mode<synchronous>, transform_indices = @transform_12, window_bounds = array<i64: 1, 32>}, {pipeline_mode = #tpu.pipeline_mode<synchronous>, transform_indices = @transform_13, window_bounds = array<i64: 1, 32>}, {transform_indices = @transform_14, window_bounds = array<i64: 8, 32>}]} {
    %c0 = arith.constant 0 : index
    %c0_0 = arith.constant 0 : index
    %0 = vector.load %arg1[%c0, %c0_0] : memref<8x32xbf16, #tpu.memory_space<vmem>>, vector<8x32xbf16>
    %1 = arith.extf %0 : vector<8x32xbf16> to vector<8x32xf32>
    %c0_1 = arith.constant 0 : index
    %c0_2 = arith.constant 0 : index
    %2 = vector.load %arg3[%c0_1, %c0_2] : memref<32x96xbf16, #tpu.memory_space<vmem>>, vector<32x96xbf16>
    %cst = arith.constant dense<0.000000e+00> : vector<8x96xf32>
    %3 = tpu.matmul %0, %2, %cst {dimension_numbers = #tpu.dot_dimension_numbers<[1], [0], [0], [1], [0, 0, 1, 1], [], []>} : vector<8x32xbf16>, vector<32x96xbf16>, vector<8x96xf32> -> vector<8x96xf32>
    %c0_3 = arith.constant 0 : index
    %c0_4 = arith.constant 0 : index
    %4 = vector.load %arg4[%c0_3, %c0_4] : memref<1x96xf32, #tpu.memory_space<vmem>>, vector<1x96xf32>
    %5 = vector.broadcast %4 : vector<1x96xf32> to vector<8x96xf32>
    %6 = arith.addf %3, %5 : vector<8x96xf32>
    %7 = vector.extract_strided_slice %6 {offsets = [0, 0], sizes = [8, 32], strides = [1, 1]} : vector<8x96xf32> to vector<8x32xf32>
    %cst_5 = arith.constant 0.353553385 : f32
    %8 = vector.broadcast %cst_5 : f32 to vector<8x32xf32>
    %9 = arith.mulf %7, %8 : vector<8x32xf32>
    %10 = vector.extract_strided_slice %6 {offsets = [0, 32], sizes = [8, 32], strides = [1, 1]} : vector<8x96xf32> to vector<8x32xf32>
    %11 = vector.extract_strided_slice %6 {offsets = [0, 64], sizes = [8, 32], strides = [1, 1]} : vector<8x96xf32> to vector<8x32xf32>
    %12 = vector.extract_strided_slice %9 {offsets = [0, 0], sizes = [8, 8], strides = [1, 1]} : vector<8x32xf32> to vector<8x8xf32>
    %13 = vector.shape_cast %12 : vector<8x8xf32> to vector<1x8x8xf32>
    %14 = arith.truncf %13 : vector<1x8x8xf32> to vector<1x8x8xbf16>
    %c0_6 = arith.constant 0 : index
    %c0_7 = arith.constant 0 : index
    %c0_8 = arith.constant 0 : index
    %c0_9 = arith.constant 0 : index
    %15 = vector.load %arg16[%c0_6, %c0_7, %c0_8, %c0_9] : memref<4x1x8x8xbf16, #tpu.memory_space<vmem>>, vector<1x1x8x8xbf16>
    %16 = vector.shape_cast %15 : vector<1x1x8x8xbf16> to vector<1x8x8xbf16>
    %17 = vector.shape_cast %14 : vector<1x8x8xbf16> to vector<1x1x8x8xbf16>
    tpu.vector_store %arg16[%c0_6, %c0_7, %c0_8, %c0_9], %17 {strides = array<i32>} : memref<4x1x8x8xbf16, #tpu.memory_space<vmem>>, vector<1x1x8x8xbf16>,
    %18 = vector.extract_strided_slice %10 {offsets = [0, 0], sizes = [8, 8], strides = [1, 1]} : vector<8x32xf32> to vector<8x8xf32>
    %19 = vector.shape_cast %18 : vector<8x8xf32> to vector<1x8x8xf32>
    %20 = arith.truncf %19 : vector<1x8x8xf32> to vector<1x8x8xbf16>
    %c0_10 = arith.constant 0 : index
    %c0_11 = arith.constant 0 : index
    %c0_12 = arith.constant 0 : index
    %c0_13 = arith.constant 0 : index
    %21 = vector.load %arg17[%c0_10, %c0_11, %c0_12, %c0_13] : memref<4x1x8x8xbf16, #tpu.memory_space<vmem>>, vector<1x1x8x8xbf16>
    %22 = vector.shape_cast %21 : vector<1x1x8x8xbf16> to vector<1x8x8xbf16>
    %23 = vector.shape_cast %20 : vector<1x8x8xbf16> to vector<1x1x8x8xbf16>
    tpu.vector_store %arg17[%c0_10, %c0_11, %c0_12, %c0_13], %23 {strides = array<i32>} : memref<4x1x8x8xbf16, #tpu.memory_space<vmem>>, vector<1x1x8x8xbf16>,
    %24 = vector.extract_strided_slice %11 {offsets = [0, 0], sizes = [8, 8], strides = [1, 1]} : vector<8x32xf32> to vector<8x8xf32>
    %25 = vector.shape_cast %24 : vector<8x8xf32> to vector<1x8x8xf32>
    %26 = arith.truncf %25 : vector<1x8x8xf32> to vector<1x8x8xbf16>
    %c0_14 = arith.constant 0 : index
    %c0_15 = arith.constant 0 : index
    %c0_16 = arith.constant 0 : index
    %c0_17 = arith.constant 0 : index
    %27 = vector.load %arg18[%c0_14, %c0_15, %c0_16, %c0_17] : memref<4x1x8x8xbf16, #tpu.memory_space<vmem>>, vector<1x1x8x8xbf16>
    %28 = vector.shape_cast %27 : vector<1x1x8x8xbf16> to vector<1x8x8xbf16>
    %29 = vector.shape_cast %26 : vector<1x8x8xbf16> to vector<1x1x8x8xbf16>
    tpu.vector_store %arg18[%c0_14, %c0_15, %c0_16, %c0_17], %29 {strides = array<i32>} : memref<4x1x8x8xbf16, #tpu.memory_space<vmem>>, vector<1x1x8x8xbf16>,
    %30 = vector.extract_strided_slice %9 {offsets = [0, 8], sizes = [8, 8], strides = [1, 1]} : vector<8x32xf32> to vector<8x8xf32>
    %31 = vector.shape_cast %30 : vector<8x8xf32> to vector<1x8x8xf32>
    %32 = arith.truncf %31 : vector<1x8x8xf32> to vector<1x8x8xbf16>
    %c1 = arith.constant 1 : index
    %c0_18 = arith.constant 0 : index
    %c0_19 = arith.constant 0 : index
    %c0_20 = arith.constant 0 : index
    %33 = vector.load %arg16[%c1, %c0_18, %c0_19, %c0_20] : memref<4x1x8x8xbf16, #tpu.memory_space<vmem>>, vector<1x1x8x8xbf16>
    %34 = vector.shape_cast %33 : vector<1x1x8x8xbf16> to vector<1x8x8xbf16>
    %35 = vector.shape_cast %32 : vector<1x8x8xbf16> to vector<1x1x8x8xbf16>
    tpu.vector_store %arg16[%c1, %c0_18, %c0_19, %c0_20], %35 {strides = array<i32>} : memref<4x1x8x8xbf16, #tpu.memory_space<vmem>>, vector<1x1x8x8xbf16>,
    %36 = vector.extract_strided_slice %10 {offsets = [0, 8], sizes = [8, 8], strides = [1, 1]} : vector<8x32xf32> to vector<8x8xf32>
    %37 = vector.shape_cast %36 : vector<8x8xf32> to vector<1x8x8xf32>
    %38 = arith.truncf %37 : vector<1x8x8xf32> to vector<1x8x8xbf16>
    %c1_21 = arith.constant 1 : index
    %c0_22 = arith.constant 0 : index
    %c0_23 = arith.constant 0 : index
    %c0_24 = arith.constant 0 : index
    %39 = vector.load %arg17[%c1_21, %c0_22, %c0_23, %c0_24] : memref<4x1x8x8xbf16, #tpu.memory_space<vmem>>, vector<1x1x8x8xbf16>
    %40 = vector.shape_cast %39 : vector<1x1x8x8xbf16> to vector<1x8x8xbf16>
    %41 = vector.shape_cast %38 : vector<1x8x8xbf16> to vector<1x1x8x8xbf16>
    tpu.vector_store %arg17[%c1_21, %c0_22, %c0_23, %c0_24], %41 {strides = array<i32>} : memref<4x1x8x8xbf16, #tpu.memory_space<vmem>>, vector<1x1x8x8xbf16>,
    %42 = vector.extract_strided_slice %11 {offsets = [0, 8], sizes = [8, 8], strides = [1, 1]} : vector<8x32xf32> to vector<8x8xf32>
    %43 = vector.shape_cast %42 : vector<8x8xf32> to vector<1x8x8xf32>
    %44 = arith.truncf %43 : vector<1x8x8xf32> to vector<1x8x8xbf16>
    %c1_25 = arith.constant 1 : index
    %c0_26 = arith.constant 0 : index
    %c0_27 = arith.constant 0 : index
    %c0_28 = arith.constant 0 : index
    %45 = vector.load %arg18[%c1_25, %c0_26, %c0_27, %c0_28] : memref<4x1x8x8xbf16, #tpu.memory_space<vmem>>, vector<1x1x8x8xbf16>
    %46 = vector.shape_cast %45 : vector<1x1x8x8xbf16> to vector<1x8x8xbf16>
    %47 = vector.shape_cast %44 : vector<1x8x8xbf16> to vector<1x1x8x8xbf16>
    tpu.vector_store %arg18[%c1_25, %c0_26, %c0_27, %c0_28], %47 {strides = array<i32>} : memref<4x1x8x8xbf16, #tpu.memory_space<vmem>>, vector<1x1x8x8xbf16>,
    %48 = vector.extract_strided_slice %9 {offsets = [0, 16], sizes = [8, 8], strides = [1, 1]} : vector<8x32xf32> to vector<8x8xf32>
    %49 = vector.shape_cast %48 : vector<8x8xf32> to vector<1x8x8xf32>
    %50 = arith.truncf %49 : vector<1x8x8xf32> to vector<1x8x8xbf16>
    %c2 = arith.constant 2 : index
    %c0_29 = arith.constant 0 : index
    %c0_30 = arith.constant 0 : index
    %c0_31 = arith.constant 0 : index
    %51 = vector.load %arg16[%c2, %c0_29, %c0_30, %c0_31] : memref<4x1x8x8xbf16, #tpu.memory_space<vmem>>, vector<1x1x8x8xbf16>
    %52 = vector.shape_cast %51 : vector<1x1x8x8xbf16> to vector<1x8x8xbf16>
    %53 = vector.shape_cast %50 : vector<1x8x8xbf16> to vector<1x1x8x8xbf16>
    tpu.vector_store %arg16[%c2, %c0_29, %c0_30, %c0_31], %53 {strides = array<i32>} : memref<4x1x8x8xbf16, #tpu.memory_space<vmem>>, vector<1x1x8x8xbf16>,
    %54 = vector.extract_strided_slice %10 {offsets = [0, 16], sizes = [8, 8], strides = [1, 1]} : vector<8x32xf32> to vector<8x8xf32>
    %55 = vector.shape_cast %54 : vector<8x8xf32> to vector<1x8x8xf32>
    %56 = arith.truncf %55 : vector<1x8x8xf32> to vector<1x8x8xbf16>
    %c2_32 = arith.constant 2 : index
    %c0_33 = arith.constant 0 : index
    %c0_34 = arith.constant 0 : index
    %c0_35 = arith.constant 0 : index
    %57 = vector.load %arg17[%c2_32, %c0_33, %c0_34, %c0_35] : memref<4x1x8x8xbf16, #tpu.memory_space<vmem>>, vector<1x1x8x8xbf16>
    %58 = vector.shape_cast %57 : vector<1x1x8x8xbf16> to vector<1x8x8xbf16>
    %59 = vector.shape_cast %56 : vector<1x8x8xbf16> to vector<1x1x8x8xbf16>
    tpu.vector_store %arg17[%c2_32, %c0_33, %c0_34, %c0_35], %59 {strides = array<i32>} : memref<4x1x8x8xbf16, #tpu.memory_space<vmem>>, vector<1x1x8x8xbf16>,
    %60 = vector.extract_strided_slice %11 {offsets = [0, 16], sizes = [8, 8], strides = [1, 1]} : vector<8x32xf32> to vector<8x8xf32>
    %61 = vector.shape_cast %60 : vector<8x8xf32> to vector<1x8x8xf32>
    %62 = arith.truncf %61 : vector<1x8x8xf32> to vector<1x8x8xbf16>
    %c2_36 = arith.constant 2 : index
    %c0_37 = arith.constant 0 : index
    %c0_38 = arith.constant 0 : index
    %c0_39 = arith.constant 0 : index
    %63 = vector.load %arg18[%c2_36, %c0_37, %c0_38, %c0_39] : memref<4x1x8x8xbf16, #tpu.memory_space<vmem>>, vector<1x1x8x8xbf16>
    %64 = vector.shape_cast %63 : vector<1x1x8x8xbf16> to vector<1x8x8xbf16>
    %65 = vector.shape_cast %62 : vector<1x8x8xbf16> to vector<1x1x8x8xbf16>
    tpu.vector_store %arg18[%c2_36, %c0_37, %c0_38, %c0_39], %65 {strides = array<i32>} : memref<4x1x8x8xbf16, #tpu.memory_space<vmem>>, vector<1x1x8x8xbf16>,
    %66 = vector.extract_strided_slice %9 {offsets = [0, 24], sizes = [8, 8], strides = [1, 1]} : vector<8x32xf32> to vector<8x8xf32>
    %67 = vector.shape_cast %66 : vector<8x8xf32> to vector<1x8x8xf32>
    %68 = arith.truncf %67 : vector<1x8x8xf32> to vector<1x8x8xbf16>
    %c3 = arith.constant 3 : index
    %c0_40 = arith.constant 0 : index
    %c0_41 = arith.constant 0 : index
    %c0_42 = arith.constant 0 : index
    %69 = vector.load %arg16[%c3, %c0_40, %c0_41, %c0_42] : memref<4x1x8x8xbf16, #tpu.memory_space<vmem>>, vector<1x1x8x8xbf16>
    %70 = vector.shape_cast %69 : vector<1x1x8x8xbf16> to vector<1x8x8xbf16>
    %71 = vector.shape_cast %68 : vector<1x8x8xbf16> to vector<1x1x8x8xbf16>
    tpu.vector_store %arg16[%c3, %c0_40, %c0_41, %c0_42], %71 {strides = array<i32>} : memref<4x1x8x8xbf16, #tpu.memory_space<vmem>>, vector<1x1x8x8xbf16>,
    %72 = vector.extract_strided_slice %10 {offsets = [0, 24], sizes = [8, 8], strides = [1, 1]} : vector<8x32xf32> to vector<8x8xf32>
    %73 = vector.shape_cast %72 : vector<8x8xf32> to vector<1x8x8xf32>
    %74 = arith.truncf %73 : vector<1x8x8xf32> to vector<1x8x8xbf16>
    %c3_43 = arith.constant 3 : index
    %c0_44 = arith.constant 0 : index
    %c0_45 = arith.constant 0 : index
    %c0_46 = arith.constant 0 : index
    %75 = vector.load %arg17[%c3_43, %c0_44, %c0_45, %c0_46] : memref<4x1x8x8xbf16, #tpu.memory_space<vmem>>, vector<1x1x8x8xbf16>
    %76 = vector.shape_cast %75 : vector<1x1x8x8xbf16> to vector<1x8x8xbf16>
    %77 = vector.shape_cast %74 : vector<1x8x8xbf16> to vector<1x1x8x8xbf16>
    tpu.vector_store %arg17[%c3_43, %c0_44, %c0_45, %c0_46], %77 {strides = array<i32>} : memref<4x1x8x8xbf16, #tpu.memory_space<vmem>>, vector<1x1x8x8xbf16>,
    %78 = vector.extract_strided_slice %11 {offsets = [0, 24], sizes = [8, 8], strides = [1, 1]} : vector<8x32xf32> to vector<8x8xf32>
    %79 = vector.shape_cast %78 : vector<8x8xf32> to vector<1x8x8xf32>
    %80 = arith.truncf %79 : vector<1x8x8xf32> to vector<1x8x8xbf16>
    %c3_47 = arith.constant 3 : index
    %c0_48 = arith.constant 0 : index
    %c0_49 = arith.constant 0 : index
    %c0_50 = arith.constant 0 : index
    %81 = vector.load %arg18[%c3_47, %c0_48, %c0_49, %c0_50] : memref<4x1x8x8xbf16, #tpu.memory_space<vmem>>, vector<1x1x8x8xbf16>
    %82 = vector.shape_cast %81 : vector<1x1x8x8xbf16> to vector<1x8x8xbf16>
    %83 = vector.shape_cast %80 : vector<1x8x8xbf16> to vector<1x1x8x8xbf16>
    tpu.vector_store %arg18[%c3_47, %c0_48, %c0_49, %c0_50], %83 {strides = array<i32>} : memref<4x1x8x8xbf16, #tpu.memory_space<vmem>>, vector<1x1x8x8xbf16>,
    %c0_51 = arith.constant 0 : index
    %c0_52 = arith.constant 0 : index
    %c0_53 = arith.constant 0 : index
    %84 = vector.load %arg2[%c0_51, %c0_52, %c0_53] : memref<1x1x8xf32, #tpu.memory_space<vmem>>, vector<1x1x8xf32>
    %85 = vector.shape_cast %84 : vector<1x1x8xf32> to vector<1x1x8xf32>
    %86 = vector.broadcast %85 : vector<1x1x8xf32> to vector<1x8x8xf32>
    %c0_i32 = arith.constant 0 : i32
    %c4_i32 = arith.constant 4 : i32
    %87 = arith.addi %c0_i32, %c4_i32 : i32
    %c1_i32 = arith.constant 1 : i32
    scf.for %arg20 = %c0_i32 to %87 step %c1_i32  : i32 {
      %187 = arith.index_cast %arg20 : i32 to index
      %c0_116 = arith.constant 0 : index
      %c0_117 = arith.constant 0 : index
      %c0_118 = arith.constant 0 : index
      %188 = vector.load %arg16[%187, %c0_116, %c0_117, %c0_118] : memref<4x1x8x8xbf16, #tpu.memory_space<vmem>>, vector<1x1x8x8xbf16>
      %189 = vector.shape_cast %188 : vector<1x1x8x8xbf16> to vector<1x8x8xbf16>
      %190 = arith.index_cast %arg20 : i32 to index
      %c0_119 = arith.constant 0 : index
      %c0_120 = arith.constant 0 : index
      %c0_121 = arith.constant 0 : index
      %191 = vector.load %arg17[%190, %c0_119, %c0_120, %c0_121] : memref<4x1x8x8xbf16, #tpu.memory_space<vmem>>, vector<1x1x8x8xbf16>
      %192 = vector.shape_cast %191 : vector<1x1x8x8xbf16> to vector<1x8x8xbf16>
      %193 = arith.index_cast %arg20 : i32 to index
      %c0_122 = arith.constant 0 : index
      %c0_123 = arith.constant 0 : index
      %c0_124 = arith.constant 0 : index
      %194 = vector.load %arg18[%193, %c0_122, %c0_123, %c0_124] : memref<4x1x8x8xbf16, #tpu.memory_space<vmem>>, vector<1x1x8x8xbf16>
      %195 = vector.shape_cast %194 : vector<1x1x8x8xbf16> to vector<1x8x8xbf16>
      "tpu.trace_start"() <{level = 10 : i32, message = "bqd,bkd->bqk"}> : () -> ()
      %cst_125 = arith.constant dense<0.000000e+00> : vector<1x8x8xf32>
      %196 = tpu.matmul %189, %192, %cst_125 {dimension_numbers = #tpu.dot_dimension_numbers<[2], [2], [1], [1], [0, 0, 0, 1, 1, 1], [0], [0]>} : vector<1x8x8xbf16>, vector<1x8x8xbf16>, vector<1x8x8xf32> -> vector<1x8x8xf32>
      "tpu.trace_stop"() : () -> ()
      %197 = arith.addf %196, %86 : vector<1x8x8xf32>
      %cst_126 = arith.constant dense<0xFF800000> : vector<1x8xf32>
      %198 = vector.multi_reduction <maximumf>, %197, %cst_126 [2] : vector<1x8x8xf32> to vector<1x8xf32>
      %199 = vector.shape_cast %198 : vector<1x8xf32> to vector<1x8x1xf32>
      %200 = vector.broadcast %199 : vector<1x8x1xf32> to vector<1x8x8xf32>
      %201 = arith.subf %197, %200 : vector<1x8x8xf32>
      %202 = math.exp %201 : vector<1x8x8xf32>
      %cst_127 = arith.constant dense<0.000000e+00> : vector<1x8xf32>
      %203 = vector.multi_reduction <add>, %202, %cst_127 [2] : vector<1x8x8xf32> to vector<1x8xf32>
      %204 = vector.shape_cast %203 : vector<1x8xf32> to vector<1x8x1xf32>
      %205 = tpu.reciprocal %204 {approx = true} : vector<1x8x1xf32> -> vector<1x8x1xf32>
      %206 = vector.broadcast %205 : vector<1x8x1xf32> to vector<1x8x8xf32>
      %207 = arith.mulf %202, %206 : vector<1x8x8xf32>
      %208 = arith.truncf %207 : vector<1x8x8xf32> to vector<1x8x8xbf16>
      "tpu.trace_start"() <{level = 10 : i32, message = "bqk,bkd->bqd"}> : () -> ()
      %cst_128 = arith.constant dense<0.000000e+00> : vector<1x8x8xf32>
      %209 = tpu.matmul %208, %195, %cst_128 {dimension_numbers = #tpu.dot_dimension_numbers<[2], [1], [1], [2], [0, 0, 0, 1, 1, 2], [0], [0]>} : vector<1x8x8xbf16>, vector<1x8x8xbf16>, vector<1x8x8xf32> -> vector<1x8x8xf32>
      "tpu.trace_stop"() : () -> ()
      %210 = arith.truncf %209 : vector<1x8x8xf32> to vector<1x8x8xbf16>
      %211 = arith.index_cast %arg20 : i32 to index
      %c0_129 = arith.constant 0 : index
      %c0_130 = arith.constant 0 : index
      %c0_131 = arith.constant 0 : index
      %212 = vector.load %arg19[%211, %c0_129, %c0_130, %c0_131] : memref<4x1x8x8xbf16, #tpu.memory_space<vmem>>, vector<1x1x8x8xbf16>
      %213 = vector.shape_cast %212 : vector<1x1x8x8xbf16> to vector<1x8x8xbf16>
      %214 = vector.shape_cast %210 : vector<1x8x8xbf16> to vector<1x1x8x8xbf16>
      tpu.vector_store %arg19[%211, %c0_129, %c0_130, %c0_131], %214 {strides = array<i32>} : memref<4x1x8x8xbf16, #tpu.memory_space<vmem>>, vector<1x1x8x8xbf16>,
    }
    %c4_i32_54 = arith.constant 4 : i32
    %c0_55 = arith.constant 0 : index
    %c0_56 = arith.constant 0 : index
    %88 = vector.load %arg6[%c0_55, %c0_56] : memref<1x32xf32, #tpu.memory_space<vmem>>, vector<1x32xf32>
    %c0_57 = arith.constant 0 : index
    %c0_58 = arith.constant 0 : index
    %c0_59 = arith.constant 0 : index
    %c0_60 = arith.constant 0 : index
    %89 = vector.load %arg19[%c0_57, %c0_58, %c0_59, %c0_60] : memref<4x1x8x8xbf16, #tpu.memory_space<vmem>>, vector<1x1x8x8xbf16>
    %90 = vector.shape_cast %89 : vector<1x1x8x8xbf16> to vector<1x8x8xbf16>
    %91 = vector.shape_cast %90 : vector<1x8x8xbf16> to vector<8x8xbf16>
    %c0_61 = arith.constant 0 : index
    %c0_62 = arith.constant 0 : index
    %92 = vector.load %arg5[%c0_61, %c0_62] : memref<32x32xbf16, #tpu.memory_space<vmem>>, vector<8x32xbf16>
    %cst_63 = arith.constant dense<0.000000e+00> : vector<8x32xf32>
    %93 = tpu.matmul %91, %92, %cst_63 {dimension_numbers = #tpu.dot_dimension_numbers<[1], [0], [0], [1], [0, 0, 1, 1], [], []>} : vector<8x8xbf16>, vector<8x32xbf16>, vector<8x32xf32> -> vector<8x32xf32>
    %94 = vector.broadcast %88 : vector<1x32xf32> to vector<8x32xf32>
    %95 = arith.addf %94, %93 : vector<8x32xf32>
    %c1_64 = arith.constant 1 : index
    %c0_65 = arith.constant 0 : index
    %c0_66 = arith.constant 0 : index
    %c0_67 = arith.constant 0 : index
    %96 = vector.load %arg19[%c1_64, %c0_65, %c0_66, %c0_67] : memref<4x1x8x8xbf16, #tpu.memory_space<vmem>>, vector<1x1x8x8xbf16>
    %97 = vector.shape_cast %96 : vector<1x1x8x8xbf16> to vector<1x8x8xbf16>
    %98 = vector.shape_cast %97 : vector<1x8x8xbf16> to vector<8x8xbf16>
    %c8 = arith.constant 8 : index
    %c0_68 = arith.constant 0 : index
    %99 = vector.load %arg5[%c8, %c0_68] : memref<32x32xbf16, #tpu.memory_space<vmem>>, vector<8x32xbf16>
    %cst_69 = arith.constant dense<0.000000e+00> : vector<8x32xf32>
    %100 = tpu.matmul %98, %99, %cst_69 {dimension_numbers = #tpu.dot_dimension_numbers<[1], [0], [0], [1], [0, 0, 1, 1], [], []>} : vector<8x8xbf16>, vector<8x32xbf16>, vector<8x32xf32> -> vector<8x32xf32>
    %101 = arith.addf %95, %100 : vector<8x32xf32>
    %c2_70 = arith.constant 2 : index
    %c0_71 = arith.constant 0 : index
    %c0_72 = arith.constant 0 : index
    %c0_73 = arith.constant 0 : index
    %102 = vector.load %arg19[%c2_70, %c0_71, %c0_72, %c0_73] : memref<4x1x8x8xbf16, #tpu.memory_space<vmem>>, vector<1x1x8x8xbf16>
    %103 = vector.shape_cast %102 : vector<1x1x8x8xbf16> to vector<1x8x8xbf16>
    %104 = vector.shape_cast %103 : vector<1x8x8xbf16> to vector<8x8xbf16>
    %c16 = arith.constant 16 : index
    %c0_74 = arith.constant 0 : index
    %105 = vector.load %arg5[%c16, %c0_74] : memref<32x32xbf16, #tpu.memory_space<vmem>>, vector<8x32xbf16>
    %cst_75 = arith.constant dense<0.000000e+00> : vector<8x32xf32>
    %106 = tpu.matmul %104, %105, %cst_75 {dimension_numbers = #tpu.dot_dimension_numbers<[1], [0], [0], [1], [0, 0, 1, 1], [], []>} : vector<8x8xbf16>, vector<8x32xbf16>, vector<8x32xf32> -> vector<8x32xf32>
    %107 = arith.addf %101, %106 : vector<8x32xf32>
    %c3_76 = arith.constant 3 : index
    %c0_77 = arith.constant 0 : index
    %c0_78 = arith.constant 0 : index
    %c0_79 = arith.constant 0 : index
    %108 = vector.load %arg19[%c3_76, %c0_77, %c0_78, %c0_79] : memref<4x1x8x8xbf16, #tpu.memory_space<vmem>>, vector<1x1x8x8xbf16>
    %109 = vector.shape_cast %108 : vector<1x1x8x8xbf16> to vector<1x8x8xbf16>
    %110 = vector.shape_cast %109 : vector<1x8x8xbf16> to vector<8x8xbf16>
    %c24 = arith.constant 24 : index
    %c0_80 = arith.constant 0 : index
    %111 = vector.load %arg5[%c24, %c0_80] : memref<32x32xbf16, #tpu.memory_space<vmem>>, vector<8x32xbf16>
    %cst_81 = arith.constant dense<0.000000e+00> : vector<8x32xf32>
    %112 = tpu.matmul %110, %111, %cst_81 {dimension_numbers = #tpu.dot_dimension_numbers<[1], [0], [0], [1], [0, 0, 1, 1], [], []>} : vector<8x8xbf16>, vector<8x32xbf16>, vector<8x32xf32> -> vector<8x32xf32>
    %113 = arith.addf %107, %112 : vector<8x32xf32>
    %114 = arith.addf %113, %1 : vector<8x32xf32>
    %c0_82 = arith.constant 0 : index
    %c0_83 = arith.constant 0 : index
    %115 = vector.load %arg7[%c0_82, %c0_83] : memref<1x32xf32, #tpu.memory_space<vmem>>, vector<1x32xf32>
    %c0_84 = arith.constant 0 : index
    %c0_85 = arith.constant 0 : index
    %116 = vector.load %arg8[%c0_84, %c0_85] : memref<1x32xf32, #tpu.memory_space<vmem>>, vector<1x32xf32>
    %cst_86 = arith.constant dense<0.000000e+00> : vector<8xf32>
    %117 = vector.multi_reduction <add>, %114, %cst_86 [1] : vector<8x32xf32> to vector<8xf32>
    %118 = vector.shape_cast %117 : vector<8xf32> to vector<8x1xf32>
    %cst_87 = arith.constant 3.200000e+01 : f32
    %119 = vector.broadcast %cst_87 : f32 to vector<8x1xf32>
    %120 = arith.divf %118, %119 : vector<8x1xf32>
    %121 = vector.broadcast %120 : vector<8x1xf32> to vector<8x32xf32>
    %122 = arith.subf %114, %121 : vector<8x32xf32>
    %123 = arith.mulf %122, %122 : vector<8x32xf32>
    %cst_88 = arith.constant dense<0.000000e+00> : vector<8xf32>
    %124 = vector.multi_reduction <add>, %123, %cst_88 [1] : vector<8x32xf32> to vector<8xf32>
    %125 = vector.shape_cast %124 : vector<8xf32> to vector<8x1xf32>
    %cst_89 = arith.constant 3.200000e+01 : f32
    %126 = vector.broadcast %cst_89 : f32 to vector<8x1xf32>
    %127 = arith.divf %125, %126 : vector<8x1xf32>
    %cst_90 = arith.constant 9.99999996E-13 : f32
    %128 = vector.broadcast %cst_90 : f32 to vector<8x1xf32>
    %129 = arith.addf %127, %128 : vector<8x1xf32>
    %130 = math.rsqrt %129 : vector<8x1xf32>
    %131 = vector.broadcast %130 : vector<8x1xf32> to vector<8x32xf32>
    %132 = arith.mulf %122, %131 : vector<8x32xf32>
    %133 = vector.broadcast %115 : vector<1x32xf32> to vector<8x32xf32>
    %134 = arith.mulf %132, %133 : vector<8x32xf32>
    %135 = vector.broadcast %116 : vector<1x32xf32> to vector<8x32xf32>
    %136 = arith.addf %134, %135 : vector<8x32xf32>
    %137 = arith.truncf %136 : vector<8x32xf32> to vector<8x32xbf16>
    %c0_91 = arith.constant 0 : index
    %c0_92 = arith.constant 0 : index
    %138 = vector.load %arg9[%c0_91, %c0_92] : memref<32x64xbf16, #tpu.memory_space<vmem>>, vector<32x64xbf16>
    %cst_93 = arith.constant dense<0.000000e+00> : vector<8x64xf32>
    %139 = tpu.matmul %137, %138, %cst_93 {dimension_numbers = #tpu.dot_dimension_numbers<[1], [0], [0], [1], [0, 0, 1, 1], [], []>} : vector<8x32xbf16>, vector<32x64xbf16>, vector<8x64xf32> -> vector<8x64xf32>
    %c0_94 = arith.constant 0 : index
    %c0_95 = arith.constant 0 : index
    %140 = vector.load %arg10[%c0_94, %c0_95] : memref<1x64xf32, #tpu.memory_space<vmem>>, vector<1x64xf32>
    %141 = vector.broadcast %140 : vector<1x64xf32> to vector<8x64xf32>
    %142 = arith.addf %139, %141 : vector<8x64xf32>
    %cst_96 = arith.constant 5.000000e-01 : f32
    %143 = vector.broadcast %cst_96 : f32 to vector<8x64xf32>
    %144 = arith.mulf %143, %142 : vector<8x64xf32>
    %cst_97 = arith.constant 4.471500e-02 : f32
    %145 = vector.broadcast %cst_97 : f32 to vector<8x64xf32>
    %146 = arith.mulf %145, %142 : vector<8x64xf32>
    %147 = arith.mulf %146, %142 : vector<8x64xf32>
    %148 = arith.mulf %147, %142 : vector<8x64xf32>
    %149 = arith.addf %142, %148 : vector<8x64xf32>
    %cst_98 = arith.constant 0.797884583 : f32
    %150 = vector.broadcast %cst_98 : f32 to vector<8x64xf32>
    %151 = arith.mulf %150, %149 : vector<8x64xf32>
    %152 = math.tanh %151 : vector<8x64xf32>
    %cst_99 = arith.constant 1.000000e+00 : f32
    %153 = vector.broadcast %cst_99 : f32 to vector<8x64xf32>
    %154 = arith.addf %153, %152 : vector<8x64xf32>
    %155 = arith.mulf %144, %154 : vector<8x64xf32>
    %156 = arith.truncf %155 : vector<8x64xf32> to vector<8x64xbf16>
    %c0_100 = arith.constant 0 : index
    %c0_101 = arith.constant 0 : index
    %157 = vector.load %arg11[%c0_100, %c0_101] : memref<64x32xbf16, #tpu.memory_space<vmem>>, vector<64x32xbf16>
    %cst_102 = arith.constant dense<0.000000e+00> : vector<8x32xf32>
    %158 = tpu.matmul %156, %157, %cst_102 {dimension_numbers = #tpu.dot_dimension_numbers<[1], [0], [0], [1], [0, 0, 1, 1], [], []>} : vector<8x64xbf16>, vector<64x32xbf16>, vector<8x32xf32> -> vector<8x32xf32>
    %c0_103 = arith.constant 0 : index
    %c0_104 = arith.constant 0 : index
    %159 = vector.load %arg12[%c0_103, %c0_104] : memref<1x32xf32, #tpu.memory_space<vmem>>, vector<1x32xf32>
    %160 = vector.broadcast %159 : vector<1x32xf32> to vector<8x32xf32>
    %161 = arith.addf %158, %160 : vector<8x32xf32>
    %162 = arith.addf %161, %136 : vector<8x32xf32>
    %c0_105 = arith.constant 0 : index
    %c0_106 = arith.constant 0 : index
    %163 = vector.load %arg13[%c0_105, %c0_106] : memref<1x32xf32, #tpu.memory_space<vmem>>, vector<1x32xf32>
    %c0_107 = arith.constant 0 : index
    %c0_108 = arith.constant 0 : index
    %164 = vector.load %arg14[%c0_107, %c0_108] : memref<1x32xf32, #tpu.memory_space<vmem>>, vector<1x32xf32>
    %cst_109 = arith.constant dense<0.000000e+00> : vector<8xf32>
    %165 = vector.multi_reduction <add>, %162, %cst_109 [1] : vector<8x32xf32> to vector<8xf32>
    %166 = vector.shape_cast %165 : vector<8xf32> to vector<8x1xf32>
    %cst_110 = arith.constant 3.200000e+01 : f32
    %167 = vector.broadcast %cst_110 : f32 to vector<8x1xf32>
    %168 = arith.divf %166, %167 : vector<8x1xf32>
    %169 = vector.broadcast %168 : vector<8x1xf32> to vector<8x32xf32>
    %170 = arith.subf %162, %169 : vector<8x32xf32>
    %171 = arith.mulf %170, %170 : vector<8x32xf32>
    %cst_111 = arith.constant dense<0.000000e+00> : vector<8xf32>
    %172 = vector.multi_reduction <add>, %171, %cst_111 [1] : vector<8x32xf32> to vector<8xf32>
    %173 = vector.shape_cast %172 : vector<8xf32> to vector<8x1xf32>
    %cst_112 = arith.constant 3.200000e+01 : f32
    %174 = vector.broadcast %cst_112 : f32 to vector<8x1xf32>
    %175 = arith.divf %173, %174 : vector<8x1xf32>
    %cst_113 = arith.constant 9.99999996E-13 : f32
    %176 = vector.broadcast %cst_113 : f32 to vector<8x1xf32>
    %177 = arith.addf %175, %176 : vector<8x1xf32>
    %178 = math.rsqrt %177 : vector<8x1xf32>
    %179 = vector.broadcast %178 : vector<8x1xf32> to vector<8x32xf32>
    %180 = arith.mulf %170, %179 : vector<8x32xf32>
    %181 = vector.broadcast %163 : vector<1x32xf32> to vector<8x32xf32>
    %182 = arith.mulf %180, %181 : vector<8x32xf32>
    %183 = vector.broadcast %164 : vector<1x32xf32> to vector<8x32xf32>
    %184 = arith.addf %182, %183 : vector<8x32xf32>
    %185 = arith.truncf %184 : vector<8x32xf32> to vector<8x32xbf16>
    %c0_114 = arith.constant 0 : index
    %c0_115 = arith.constant 0 : index
    %186 = vector.load %arg15[%c0_114, %c0_115] : memref<8x32xbf16, #tpu.memory_space<vmem>>, vector<8x32xbf16>
    tpu.vector_store %arg15[%c0_114, %c0_115], %185 {strides = array<i32>} : memref<8x32xbf16, #tpu.memory_space<vmem>>, vector<8x32xbf16>,
    return
  }
  func.func @transform_0(%arg0: i32) -> (i32, i32) {
    %c0_i32 = arith.constant 0 : i32
    %c0_i32_0 = arith.constant 0 : i32
    return %arg0, %c0_i32 : i32, i32
  }
  func.func @transform_1(%arg0: i32) -> (i32, i32, i32) {
    %c0_i32 = arith.constant 0 : i32
    %c0_i32_0 = arith.constant 0 : i32
    %c0_i32_1 = arith.constant 0 : i32
    return %arg0, %c0_i32, %c0_i32_0 : i32, i32, i32
  }
  func.func @transform_2(%arg0: i32) -> (i32, i32) {
    %c0_i32 = arith.constant 0 : i32
    %c0_i32_0 = arith.constant 0 : i32
    %c0_i32_1 = arith.constant 0 : i32
    return %c0_i32, %c0_i32_0 : i32, i32
  }
  func.func @transform_3(%arg0: i32) -> (i32, i32) {
    %c0_i32 = arith.constant 0 : i32
    %c0_i32_0 = arith.constant 0 : i32
    %c0_i32_1 = arith.constant 0 : i32
    return %c0_i32, %c0_i32_0 : i32, i32
  }
  func.func @transform_4(%arg0: i32) -> (i32, i32) {
    %c0_i32 = arith.constant 0 : i32
    %c0_i32_0 = arith.constant 0 : i32
    %c0_i32_1 = arith.constant 0 : i32
    return %c0_i32, %c0_i32_0 : i32, i32
  }
  func.func @transform_5(%arg0: i32) -> (i32, i32) {
    %c0_i32 = arith.constant 0 : i32
    %c0_i32_0 = arith.constant 0 : i32
    %c0_i32_1 = arith.constant 0 : i32
    return %c0_i32, %c0_i32_0 : i32, i32
  }
  func.func @transform_6(%arg0: i32) -> (i32, i32) {
    %c0_i32 = arith.constant 0 : i32
    %c0_i32_0 = arith.constant 0 : i32
    %c0_i32_1 = arith.constant 0 : i32
    return %c0_i32, %c0_i32_0 : i32, i32
  }
  func.func @transform_7(%arg0: i32) -> (i32, i32) {
    %c0_i32 = arith.constant 0 : i32
    %c0_i32_0 = arith.constant 0 : i32
    %c0_i32_1 = arith.constant 0 : i32
    return %c0_i32, %c0_i32_0 : i32, i32
  }
  func.func @transform_8(%arg0: i32) -> (i32, i32) {
    %c0_i32 = arith.constant 0 : i32
    %c0_i32_0 = arith.constant 0 : i32
    %c0_i32_1 = arith.constant 0 : i32
    return %c0_i32, %c0_i32_0 : i32, i32
  }
  func.func @transform_9(%arg0: i32) -> (i32, i32) {
    %c0_i32 = arith.constant 0 : i32
    %c0_i32_0 = arith.constant 0 : i32
    %c0_i32_1 = arith.constant 0 : i32
    return %c0_i32, %c0_i32_0 : i32, i32
  }
  func.func @transform_10(%arg0: i32) -> (i32, i32) {
    %c0_i32 = arith.constant 0 : i32
    %c0_i32_0 = arith.constant 0 : i32
    %c0_i32_1 = arith.constant 0 : i32
    return %c0_i32, %c0_i32_0 : i32, i32
  }
  func.func @transform_11(%arg0: i32) -> (i32, i32) {
    %c0_i32 = arith.constant 0 : i32
    %c0_i32_0 = arith.constant 0 : i32
    %c0_i32_1 = arith.constant 0 : i32
    return %c0_i32, %c0_i32_0 : i32, i32
  }
  func.func @transform_12(%arg0: i32) -> (i32, i32) {
    %c0_i32 = arith.constant 0 : i32
    %c0_i32_0 = arith.constant 0 : i32
    %c0_i32_1 = arith.constant 0 : i32
    return %c0_i32, %c0_i32_0 : i32, i32
  }
  func.func @transform_13(%arg0: i32) -> (i32, i32) {
    %c0_i32 = arith.constant 0 : i32
    %c0_i32_0 = arith.constant 0 : i32
    %c0_i32_1 = arith.constant 0 : i32
    return %c0_i32, %c0_i32_0 : i32, i32
  }
  func.func @transform_14(%arg0: i32) -> (i32, i32) {
    %c0_i32 = arith.constant 0 : i32
    %c0_i32_0 = arith.constant 0 : i32
    return %arg0, %c0_i32 : i32, i32
  }
}

</mosaic_0001>

<bundles_post_ra>
// kernel: mbert_forward.4
= control target key start
LH: loop header
LB: loop body
LE: loop exit
PB: predicated region body
PF: predicated region fallthrough
CT: control target
= control target key end

     0   :  { %vm26_vm0 = vcmask 261120   ;;  %s196_s0 = inlined_call_operand.vmem [shape: f32[16,32], index: 0, kind: input, shape index: {}]   ;;  %s197_s1 = inlined_call_operand.vmem [shape: f32[16,32], index: 1, kind: input, shape index: {}]   ;;  %s198_s2 = inlined_call_operand.vmem [shape: f32[1,32], index: 2, kind: input, shape index: {}]   ;;  %s199_s3 = inlined_call_operand.vmem [shape: f32[1,32], index: 3, kind: input, shape index: {}]   ;;  %s200_s4 = inlined_call_operand.hbm [shape: bf16[16,32], index: 4, kind: output, shape index: {}]  }
   0x1   :  { %v18_v0 = vld [vmem:[%s196_s0] sm:$0xff]  ;;  %v19_v2 = vld [vmem:[%s196_s0 + $0x8] sm:$0xff] }
   0x2   :  { %v20_v1 = vld [vmem:[%s197_s1] sm:$0xff]  ;;  %v21_v4 = vld [vmem:[%s197_s1 + $0x8] sm:$0xff] }
   0x3   :  { %v22_v3 = vadd.f32 %v20_v1, %v18_v0 }
   0x4   :  { %9 = vsyncpa [#allocation3], 0  ;;  %v23_v5 = vadd.f32 %v21_v4, %v19_v2  ;;  %v97_v25 = vld [vmem:[%s198_s2] ss:$0 sm:$0xff]  ;;  %vm78_vm1 = vcmask 257024   ;;  %s134_s25 = smov [#allocation2]  }
   0x5   :  { %v27_v6 = vsel %vm26_vm0, %v22_v3, 0.0  ;;  %v98_v27 = vld [vmem:[%s199_s3] ss:$0 sm:$0xff]  ;;  %s86_s26 = sshll.u32 %s134_s25, 4  ;;  %s87_s26 = int_to_ptr.vmem [resolvable:$true] %s86_s26 }
   0x6   :  { %28 = vadd.xlane.f32.xlu0 %v27_v6  ;;  %v30_v7 = vsel %vm26_vm0, %v23_v5, 0.0  ;;  %s110_s2 = scalar_lea.vmem %s87_s26, 128  ;;  %p115_p1 = scmp.lt.s32.totalorder %s87_s26, %s87_s26 }
   0x7   :  { %p111_p0 = scmp.ne.s32.totalorder %s87_s26, %s110_s2  ;;  %p116_p2 = scmp.lt.s32.totalorder %s110_s2, %s110_s2 }
   0x9   :  { %p117_p3 = por %p116_p2, %p115_p1 }
   0xa   :  { %31 = vadd.xlane.f32.xlu0 %v30_v7 }
   0xb   :  { %p118_p4 = pnand %p117_p3, %p111_p0 }
  0x93   :  { %v29_v8 = vpop.xlane.xlu0 %28 }
  0x94   :  { %v34_v9 = vmul.f32 0.03125, %v29_v8 }
  0x96   :  { %v36_v10 = vsub.f32 %v22_v3, %v34_v9 }
  0x97   :  { %v32_v11 = vpop.xlane.xlu0 %31 }
  0x98   :  { %v35_v12 = vmul.f32 0.03125, %v32_v11  ;;  %v38_v13 = vmul.f32 %v36_v10, %v36_v10 }
  0x9a   :  { %v37_v14 = vsub.f32 %v23_v5, %v35_v12  ;;  %v40_v15 = vsel %vm26_vm0, %v38_v13, 0.0 }
  0x9b   :  { %41 = vadd.xlane.f32.xlu1 %v40_v15 }
  0x9c   :  { %v39_v16 = vmul.f32 %v37_v14, %v37_v14 }
  0x9e   :  { %v43_v17 = vsel %vm26_vm0, %v39_v16, 0.0 }
  0x9f   :  { %44 = vadd.xlane.f32.xlu1 %v43_v17 }
 0x128   :  { %v42_v18 = vpop.xlane.xlu1 %41 }
 0x129   :  { %v46_v19 = vmul.f32 0.03125, %v42_v18 }
 0x12b   :  { %v48_v20 = vadd.f32 1e-12, %v46_v19 }
 0x12c   :  { %v45_v21 = vpop.xlane.xlu1 %44 }
 0x12d   :  { %106 = vrsqrt.f32 %v48_v20  ;;  %v47_v22 = vmul.f32 0.03125, %v45_v21 }
 0x12f   :  { %v49_v23 = vadd.f32 1e-12, %v47_v22 }
 0x131   :  { %108 = vrsqrt.f32 %v49_v23 }
 0x137   :  { %v107_v24 = vpop.eup %106 }
 0x138   :  { %v52_v26 = vmul.f32 %v107_v24, %v36_v10 }
 0x13a   :  { %v60_v28 = vmul.f32 %v97_v25, %v52_v26 }
 0x13b   :  { %v109_v29 = vpop.eup %108 }
 0x13c   :  { %v53_v30 = vmul.f32 %v109_v29, %v37_v14  ;;  %v68_v31 = vadd.f32 %v98_v27, %v60_v28 }
 0x13e   :  { %v61_v32 = vmul.f32 %v97_v25, %v53_v30  ;;  %v101_v33 = vpack.c.bf16 %v68_v31, %v68_v31 }
 0x140   :  { %v69_v34 = vadd.f32 %v98_v27, %v61_v32  ;;  %79 = vst.msk [vmem:[#allocation2] sm:$0xf] %vm78_vm1, %v101_v33 }
 0x142   :  { %v102_v35 = vpack.c.bf16 %v69_v34, %v69_v34 }
 0x144   :  { %80 = vst.msk [vmem:[#allocation2 + $0x4] sm:$0xf] %vm78_vm1, %v102_v35 }
 0x145   :  { %121 = shalt.err (!%p118_p4)
}
 0x146   :  { %s122_s28 = scalar_lea.hbm %s200_s4, 128 }
 0x147   :  { %p123_p5 = scmp.ne.s32.totalorder %s200_s4, %s122_s28  ;;  %p126_p6 = scmp.lt.u32.totalorder %s122_s28, %s200_s4 }
 0x149   :  { %p128_p7 = pnand %p126_p6, %p123_p5 }
 0x14b   :  { %131 = shalt.err (!%p128_p7)
}
 0x14c   :  { %s135_s7 = smov 64   ;;  %s136_s8 = smov 4  }
 0x14d   :  { %92 = dma.vmem_to_hbm [thread:$0]  %s87_s26, 128, %s200_s4, [#allocation3], %s135_s7, %s135_s7, %s136_s8  }
 0x14e   :  { %132 = dma.done.wait [#allocation3], 128  }
 0x14f   :  { %133 = vsyncadd [#allocation3], 4294967168 }
 0x150   :  { %96 = vsyncpa [#allocation3], 1 }

// kernel: mbert_forward.7
= control target key start
LH: loop header
LB: loop body
LE: loop exit
PB: predicated region body
PF: predicated region fallthrough
CT: control target
= control target key end

     0   :  { %13 = vsyncpa [#allocation3], 0  ;;  %s474_s0 = inlined_call_operand.vmem [shape: bf16[2,32], index: 0, kind: input, shape index: {}]   ;;  %s475_s1 = inlined_call_operand.vmem [shape: bf16[32,32], index: 1, kind: input, shape index: {}]   ;;  %s476_s2 = inlined_call_operand.vmem [shape: f32[1,32], index: 2, kind: input, shape index: {}]   ;;  %s477_s3 = inlined_call_operand.hbm [shape: bf16[32,128], index: 3, kind: input, shape index: {}]   ;;  %s478_s4 = inlined_call_operand.vmem [shape: f32[1,128], index: 4, kind: input, shape index: {}]   ;;  %s479_s5 = inlined_call_operand.vmem [shape: f32[2,128], index: 5, kind: input, shape index: {}]   ;;  %s480_s6 = inlined_call_operand.hbm [shape: f32[2,128], index: 6, kind: output, shape index: {0}]   ;;  %s481_s7 = inlined_call_operand.hbm [shape: f32[1,1], index: 7, kind: output, shape index: {1}]  }
   0x1   :  { %14 = vsyncpa [#allocation4], 0 }
   0x2   :  { %15 = vsyncpa [#allocation7], 0  ;;  %s368_s24 = smov [#allocation2]   ;;  %s296_s28 = scalar_lea.hbm %s477_s3, 256 }
   0x3   :  { %s27_s25 = sshll.u32 %s368_s24, 4  ;;  %p297_p0 = scmp.ne.s32.totalorder %s477_s3, %s296_s28  ;;  %s28_s25 = int_to_ptr.vmem [resolvable:$true] %s27_s25 }
   0x4   :  { %p300_p1 = scmp.lt.u32.totalorder %s296_s28, %s477_s3 }
   0x6   :  { %p302_p2 = pnand %p300_p1, %p297_p0 }
   0x8   :  { %305 = shalt.err (!%p302_p2)
}
   0x9   :  { %s306_s10 = scalar_lea.vmem %s28_s25, 256  ;;  %p311_p4 = scmp.lt.s32.totalorder %s28_s25, %s28_s25 }
   0xa   :  { %p307_p3 = scmp.ne.s32.totalorder %s28_s25, %s306_s10  ;;  %p312_p5 = scmp.lt.s32.totalorder %s306_s10, %s306_s10 }
   0xc   :  { %p313_p6 = por %p312_p5, %p311_p4 }
   0xe   :  { %p314_p7 = pnand %p313_p6, %p307_p3 }
  0x10   :  { %317 = shalt.err (!%p314_p7)
}
  0x11   :  { %s369_s11 = smov 64   ;;  %s370_s12 = smov 4  }
  0x12   :  { %33 = dma.hbm_to_vmem [thread:$0]  %s477_s3, 256, %s28_s25, [#allocation3], %s369_s11, %s369_s11, %s370_s12  }
  0x13   :  { %362 = dma.done.wait [#allocation3], 256  }
  0x14   :  { %363 = vsyncadd [#allocation3], 4294967040  ;;  %v371_v0 = vmov 0.0   ;;  %vm372_vm0 = vmmov 0   ;;  %v286_v1 = vld [vmem:[%s475_s1] sm:$0xff]   ;;  %v287_v2 = vld [vmem:[%s475_s1 + $0x8] sm:$0xff]   ;;  %v179_v14 = vlaneseq }
  0x15   :  { %261 = vmatprep.subr.bf16.mxu0 %v371_v0  ;;  %265 = vmatprep.mubr.msk.bf16.mxu0 %vm372_vm0, %v371_v0  ;;  %v42_v3 = vld [vmem:[%s474_s0] sm:$0x1]  ;;  %vm66_vm1 = vcmask 261120   ;;  %v289_v5 = vld [vmem:[#allocation2 + $0x8] sm:$0xff]   ;;  %vm183_vm3 = vcmask 1041408   ;;  %vm202_vm4 = vcmask 1024  }
  0x16   :  { %269 = vmatprep.subr.bf16.mxu1 %v371_v0  ;;  %273 = vmatprep.mubr.msk.bf16.mxu1 %vm372_vm0, %v371_v0  ;;  %v288_v4 = vld [vmem:[#allocation2] sm:$0xff]   ;;  %v180_v15 = vand.u32 127, %v179_v14  ;;  %s373_s22 = smov [#allocation5]  }
  0x17   :  { %262 = vmatpush3.bf16.msra.mxu0 %v286_v1  ;;  %270 = vmatpush3.bf16.msra.mxu1 %v288_v4  ;;  %v247_v6 = vld [vmem:[%s476_s2] ss:$0 sm:$0xff]  ;;  %s224_s23 = sshll.u32 %s373_s22, 4  ;;  %s225_s23 = int_to_ptr.vmem [resolvable:$true] %s224_s23 }
  0x18   :  { %263 = vmatprep.subr.bf16.mxu0 %v371_v0  ;;  %271 = vmatprep.subr.bf16.mxu1 %v371_v0  ;;  %v251_v16 = vld [vmem:[%s478_s4] ss:$0 sm:$0xff]  ;;  %vm181_vm2 = vcmp.lt.s32.totalorder %v180_v15, 3  ;;  %s318_s24 = scalar_lea.vmem %s225_s23, 32  ;;  %p323_p9 = scmp.lt.s32.totalorder %s225_s23, %s225_s23 }
  0x19   :  { %v196_v33 = vld [vmem:[%s479_s5] sm:$0x3]  ;;  %p319_p8 = scmp.ne.s32.totalorder %s225_s23, %s318_s24  ;;  %p324_p10 = scmp.lt.s32.totalorder %s318_s24, %s318_s24 }
  0x1b   :  { %264 = vmatpush3.bf16.msra.mxu0 %v287_v2  ;;  %272 = vmatpush3.bf16.msra.mxu1 %v289_v5  ;;  %p325_p11 = por %p324_p10, %p323_p9 }
  0x1d   :  { %p326_p12 = pnand %p325_p11, %p319_p8 }
  0x1e   :  { %266 = vmatmul.mubr.msk.bf16.vlgmr.msra.gmra.mrb[0].mxu0 %vm66_vm1, %v42_v3 }
  0xf1   :  { %v104_v7 = vpop.f32.mrb[0].mxu0 }
  0xf2   :  { %v105_v8 = vadd.f32 %v247_v6, %v104_v7  ;;  %v267_v9 = vpop.f32.mrb[1].mxu0 }
  0xf3   :  { %v107_v10 = vpop.f32.mrb[2].mxu0 }
  0xf4   :  { %290 = vtanh.f32 %v105_v8  ;;  %v268_v11 = vpop.f32.mrb[3].mxu0 }
  0xfe   :  { %v291_v12 = vpop.eup %290 }
  0xff   :  { %v111_v13 = vpack.c.bf16 %v291_v12, %v291_v12 }
 0x101   :  { %274 = vmatmul.mubr.msk.bf16.vlgmr.msra.gmra.mrb[0].mxu1 %vm66_vm1, %v111_v13 }
 0x1d4   :  { %v172_v17 = vpop.f32.mrb[0].mxu1 }
 0x1d5   :  { %v173_v18 = vadd.f32 %v251_v16, %v172_v17  ;;  %v275_v19 = vpop.f32.mrb[1].mxu1 }
 0x1d6   :  { %v175_v20 = vpop.f32.mrb[2].mxu1 }
 0x1d7   :  { %178 = vst [vmem:[#allocation5] sm:$0x3] %v173_v18  ;;  %v276_v21 = vpop.f32.mrb[3].mxu1  ;;  %v182_v22 = vsel %vm181_vm2, %v173_v18, -1e+30 }
 0x1d8   :  { %v184_v23 = vsel %vm183_vm3, %v182_v22, -inf }
 0x1d9   :  { %185 = vmax.xlane.f32.xlu0 %v184_v23 }
 0x266   :  { %v186_v24 = vpop.xlane.xlu0 %185 }
 0x267   :  { %v187_v25 = vsub.f32 %v182_v22, %v186_v24 }
 0x269   :  { %v188_v26 = vmul.f32 1.442695, %v187_v25 }
 0x26b   :  { %292 = vpow2.f32 %v188_v26 }
 0x275   :  { %v293_v27 = vpop.eup %292 }
 0x276   :  { %v190_v28 = vsel %vm183_vm3, %v293_v27, 0.0 }
 0x277   :  { %191 = vadd.xlane.f32.xlu0 %v190_v28 }
 0x304   :  { %v192_v29 = vpop.xlane.xlu0 %191 }
 0x305   :  { %294 = vlog2.f32 %v192_v29 }
 0x30f   :  { %v295_v30 = vpop.eup %294 }
 0x310   :  { %v194_v31 = vmul.f32 0.6931472, %v295_v30 }
 0x312   :  { %v195_v32 = vadd.f32 %v194_v31, %v186_v24 }
 0x314   :  { %v197_v34 = vsub.f32 %v195_v32, %v173_v18 }
 0x316   :  { %v198_v35 = vmul.f32 %v197_v34, %v196_v33 }
 0x318   :  { %v199_v36 = vsel %vm183_vm3, %v198_v35, 0.0 }
 0x319   :  { %200 = vadd.xlane.f32.xlu1 %v199_v36 }
 0x3a6   :  { %v201_v37 = vpop.xlane.xlu1 %200 }
 0x3a7   :  { %v203_v38 = vsel %vm202_vm4, %v201_v37, 0.0 }
 0x3a8   :  { %204 = vadd.xlane.f32.xlu1 %v203_v38 }
 0x3a9   :  { %329 = shalt.err (!%p326_p12)
}
 0x3aa   :  { %s330_s26 = scalar_lea.hbm %s480_s6, 32 }
 0x3ab   :  { %p331_p13 = scmp.ne.s32.totalorder %s480_s6, %s330_s26  ;;  %p334_p0 = scmp.lt.u32.totalorder %s330_s26, %s480_s6 }
 0x3ad   :  { %p336_p1 = pnand %p334_p0, %p331_p13 }
 0x3af   :  { %339 = shalt.err (!%p336_p1)
}
 0x3b0   :  { %227 = dma.vmem_to_hbm [thread:$0]  %s225_s23, 32, %s480_s6, [#allocation4]   ;;  %vm216_vm5 = vcmask 0  }
 0x3b1   :  { %s374_s10 = smov [#allocation6]  }
 0x3b2   :  { %s234_s11 = sshll.u32 %s374_s10, 4  ;;  %s235_s11 = int_to_ptr.vmem [resolvable:$true] %s234_s11 }
 0x3b3   :  { %s340_s13 = scalar_lea.vmem %s235_s11, 16  ;;  %s344_s14 = scalar_lea.vmem %s235_s11, 32 }
 0x3b4   :  { %p341_p2 = scmp.ne.s32.totalorder %s235_s11, %s340_s13  ;;  %p345_p3 = scmp.lt.s32.totalorder %s235_s11, %s235_s11 }
 0x3b5   :  { %p346_p4 = scmp.lt.s32.totalorder %s344_s14, %s340_s13 }
 0x3b7   :  { %p347_p5 = por %p346_p4, %p345_p3 }
 0x3b9   :  { %p348_p6 = pnand %p347_p5, %p341_p2 }
 0x435   :  { %v205_v39 = vpop.xlane.xlu1 %204 }
 0x436   :  { %v206_v40 = vrot.slane %v205_v39, 4 }
 0x438   :  { %v207_v41 = vadd.f32 %v206_v40, %v205_v39 }
 0x43a   :  { %v208_v42 = vrot.slane %v207_v41, 2 }
 0x43c   :  { %v209_v43 = vadd.f32 %v208_v42, %v207_v41 }
 0x43e   :  { %v210_v44 = vrot.slane %v209_v43, 1 }
 0x440   :  { %v211_v45 = vadd.f32 %v210_v44, %v209_v43 }
 0x442   :  { %277 = vpush %v211_v45 }
 0x473   :  { %s278_s12 = spop %277 }
 0x474   :  { %v213_v46 = vstv %s278_s12 }
 0x475   :  { %v215_v47 = vmul.f32 0.5, %v213_v46 }
 0x477   :  { %217 = vst.msk [vmem:[#allocation6] sm:$0x1] %vm216_vm5, %v215_v47 }
 0x478   :  { %351 = shalt.err (!%p348_p6)
}
 0x479   :  { %s352_s16 = scalar_lea.hbm %s481_s7, 16 }
 0x47a   :  { %p353_p7 = scmp.ne.s32.totalorder %s481_s7, %s352_s16  ;;  %p356_p8 = scmp.lt.u32.totalorder %s352_s16, %s481_s7 }
 0x47c   :  { %p358_p9 = pnand %p356_p8, %p353_p7 }
 0x47e   :  { %361 = shalt.err (!%p358_p9)
}
 0x47f   :  { %237 = dma.vmem_to_hbm [thread:$0]  %s235_s11, 16, %s481_s7, [#allocation7]  }
 0x480   :  { %364 = dma.done.wait [#allocation4], 32  }
 0x481   :  { %365 = vsyncadd [#allocation4], 4294967264 }
 0x482   :  { %366 = dma.done.wait [#allocation7], 16  }
 0x483   :  { %367 = vsyncadd [#allocation7], 4294967280 }
 0x484   :  { %244 = vsyncpa [#allocation3], 1 }
 0x485   :  { %245 = vsyncpa [#allocation4], 1 }
 0x486   :  { %246 = vsyncpa [#allocation7], 1 }

// kernel: mbert_forward.5
= control target key start
LH: loop header
LB: loop body
LE: loop exit
PB: predicated region body
PF: predicated region fallthrough
CT: control target
= control target key end

     0   :  { %s3176_s0 = inlined_call_operand.hbm [shape: bf16[16,32], index: 0, kind: input, shape index: {}]   ;;  %s3177_s1 = inlined_call_operand.hbm [shape: f32[2,1,8], index: 1, kind: input, shape index: {}]   ;;  %s3178_s2 = inlined_call_operand.hbm [shape: bf16[32,96], index: 2, kind: input, shape index: {}]   ;;  %s3179_s3 = inlined_call_operand.hbm [shape: f32[1,96], index: 3, kind: input, shape index: {}]   ;;  %s3180_s4 = inlined_call_operand.hbm [shape: bf16[32,32], index: 4, kind: input, shape index: {}]   ;;  %s3181_s5 = inlined_call_operand.hbm [shape: f32[1,32], index: 5, kind: input, shape index: {}]   ;;  %s3182_s6 = inlined_call_operand.hbm [shape: f32[1,32], index: 6, kind: input, shape index: {}]   ;;  %s3183_s7 = inlined_call_operand.hbm [shape: f32[1,32], index: 7, kind: input, shape index: {}]   ;;  %s3184_s8 = inlined_call_operand.hbm [shape: bf16[32,64], index: 8, kind: input, shape index: {}]   ;;  %s3185_s9 = inlined_call_operand.hbm [shape: f32[1,64], index: 9, kind: input, shape index: {}]   ;;  %s3186_s10 = inlined_call_operand.hbm [shape: bf16[64,32], index: 10, kind: input, shape index: {}]   ;;  %s3187_s11 = inlined_call_operand.hbm [shape: f32[1,32], index: 11, kind: input, shape index: {}]   ;;  %s3188_s12 = inlined_call_operand.hbm [shape: f32[1,32], index: 12, kind: input, shape index: {}]   ;;  %s3189_s13 = inlined_call_operand.hbm [shape: f32[1,32], index: 13, kind: input, shape index: {}]   ;;  %s3190_s14 = inlined_call_operand.hbm [shape: bf16[16,32], index: 14, kind: output, shape index: {}]  }
   0x1   :  { %3204 = sst [smem:[#allocation43_spill]] %s3176_s0 }
   0x2   :  { %3205 = sst [smem:[#allocation44_spill]] %s3177_s1 }
   0x3   :  { %3206 = sst [smem:[#allocation45_spill]] %s3178_s2 }
   0x4   :  { %3207 = sst [smem:[#allocation46_spill]] %s3179_s3 }
   0x5   :  { %3208 = sst [smem:[#allocation47_spill]] %s3180_s4 }
   0x6   :  { %3209 = sst [smem:[#allocation48_spill]] %s3181_s5 }
   0x7   :  { %3210 = sst [smem:[#allocation49_spill]] %s3182_s6 }
   0x8   :  { %3211 = sst [smem:[#allocation50_spill]] %s3190_s14 }
   0x9   :  { %19 = vsyncpa [#allocation7], 0 }
   0xa   :  { %21 = vsyncpa [#allocation7 + $0x1], 0 }
   0xb   :  { %22 = vsyncpa [#allocation10], 0 }
   0xc   :  { %24 = vsyncpa [#allocation10 + $0x1], 0 }
   0xd   :  { %25 = vsyncpa [#allocation13], 0 }
   0xe   :  { %26 = vsyncpa [#allocation16], 0 }
   0xf   :  { %27 = vsyncpa [#allocation19], 0 }
  0x10   :  { %28 = vsyncpa [#allocation22], 0 }
  0x11   :  { %29 = vsyncpa [#allocation25], 0 }
  0x12   :  { %30 = vsyncpa [#allocation28], 0 }
  0x13   :  { %31 = vsyncpa [#allocation8], 0 }
  0x14   :  { %33 = vsyncpa [#allocation8 + $0x1], 0  ;;  %s2588_s29 = smov 0   ;;  %s2590_s30 = smov 0  }
  0x15   :  { %s2592_s15 = smov 0   ;;  %s2594_s16 = smov 0  }
  0x16 LB: > { %3212 = sst [smem:[#allocation40_spill]] %s2463_s29  ;;  %s2481_s17 = smov [#allocation11]   ;;  %s2475_s16 = sphi %s2594_s16, %s3262_s16   ;;  %s2471_s15 = sphi %s2592_s15, %s3261_s15   ;;  %s2467_s30 = sphi %s2590_s30, %s3260_s30   ;;  %s2463_s29 = sphi %s2588_s29, %s3259_s29  }
  0x17   : > { %s386_s18 = sshll.u32 %s2481_s17, 4  ;;  %s2609_s19 = sadd.s32 4294967295, %s2475_s16   ;;  %s2614_s18 = int_to_ptr.vmem [resolvable:$true] %s386_s18 }
  0x18   : > { %3213 = sst [smem:[#allocation41_spill]] %s2609_s19  ;;  %p1605_p0 = scmp.ge.s32.totalorder %s2475_s16, 1 }
  0x19   : > { %p3200_p1 = scmp.eq.s32.totalorder %s2609_s19, 0  ;;  %p374_p2 = scmp.lt.s32.totalorder %s2475_s16, 3 }
  0x1a   : > { %s2482_s21 = smov [#allocation12]   ;;  %s2483_s24 = smov [#allocation15]  }
  0x1b   : > { %p2616_p3 = pnand %p1605_p0, %p374_p2  ;;  %s400_s22 = sshll.u32 %s2482_s21, 4  ;;  %s2629_s22 = int_to_ptr.vmem [resolvable:$true] %s400_s22 }
  0x1c   : > { %s424_s25 = sshll.u32 %s2483_s24, 4  ;;  %s3217_s2 = sld [smem:[#allocation45_spill]]  ;;  %s2631_s25 = int_to_ptr.vmem [resolvable:$true] %s424_s25 }
  0x1d   : > { %s3214_s20 = scalar_select %p2616_p3, 1, 0 }
  0x1e   : > { %p1816_p5 = pneg %p2616_p3 }
  0x1f   : > { %3215 = sst [smem:[#allocation42_spill]] %s3214_s20 }
  0x20   : > { %p2625_p6 = pnand %p1816_p5, %p3200_p1 }
  0x22   : > { %s1977_s28 = scalar_lea.hbm %s3217_s2, 256  ;;  %p2641_p8 = pneg %p2625_p6 }
  0x23   : > { %p1978_p7 = scmp.ne.s32.totalorder %s3217_s2, %s1977_s28  ;;  %p1984_p11 = scmp.lt.u32.totalorder %s1977_s28, %s3217_s2 }
  0x25   : > { %p1980_p9 = pnand %p2641_p8, %p1978_p7 }
  0x27   : > { %p1981_p10 = pneg %p1980_p9 }
  0x29   : > { %p1986_p12 = pnand %p1984_p11, %p1981_p10 }
  0x2b   : > { %1989 = shalt.err (!%p1986_p12)
}
  0x2c   : > { %s1990_s14 = scalar_lea.vmem %s2614_s18, 256  ;;  %p1998_p5 = scmp.lt.s32.totalorder %s2614_s18, %s2614_s18 }
  0x2d   : > { %p1991_p13 = scmp.ne.s32.totalorder %s2614_s18, %s1990_s14  ;;  %p1999_p4 = scmp.lt.s32.totalorder %s1990_s14, %s1990_s14 }
  0x2f   : > { %p1993_p0 = pnand %p1991_p13, %p2641_p8  ;;  %p2000_p7 = por %p1999_p4, %p1998_p5 }
  0x31   : > { %p1994_p2 = pneg %p1993_p0 }
  0x33   : > { %p2001_p9 = pnand %p2000_p7, %p1994_p2 }
  0x35   : > { %2004 = shalt.err (!%p2001_p9)
}
  0x36   : > { %s3198_s26 = smov 64   ;;  %s2485_s20 = smov 4  }
  0x37   : > { %1819 = dma.hbm_to_vmem [thread:$0]  (!%p2625_p6), %s3217_s2, 256, %s2614_s18, [#allocation10], %s3198_s26, %s3198_s26, %s2485_s20  }
  0x38   : > { %s3219_s3 = sld [smem:[#allocation46_spill]] }
  0x3e   : > { %s2005_s14 = scalar_lea.hbm %s3219_s3, 16 }
  0x3f   : > { %p2006_p4 = scmp.ne.s32.totalorder %s3219_s3, %s2005_s14  ;;  %p2012_p12 = scmp.lt.u32.totalorder %s2005_s14, %s3219_s3 }
  0x41   : > { %p2008_p10 = pnand %p2006_p4, %p2641_p8 }
  0x43   : > { %p2009_p11 = pneg %p2008_p10 }
  0x45   : > { %p2014_p13 = pnand %p2012_p12, %p2009_p11 }
  0x47   : > { %2017 = shalt.err (!%p2014_p13)
}
  0x48   : > { %s2018_s18 = scalar_lea.vmem %s2629_s22, 16  ;;  %s2025_s0 = scalar_lea.vmem %s2629_s22, 32 }
  0x49   : > { %p2019_p0 = scmp.ne.s32.totalorder %s2629_s22, %s2018_s18  ;;  %p2026_p7 = scmp.lt.s32.totalorder %s2629_s22, %s2629_s22 }
  0x4a   : > { %p2027_p9 = scmp.lt.s32.totalorder %s2025_s0, %s2018_s18 }
  0x4b   : > { %p2021_p2 = pnand %p2019_p0, %p2641_p8 }
  0x4c   : > { %p2028_p4 = por %p2027_p9, %p2026_p7 }
  0x4d   : > { %p2022_p5 = pneg %p2021_p2 }
  0x4f   : > { %p2029_p10 = pnand %p2028_p4, %p2022_p5 }
  0x51   : > { %2032 = shalt.err (!%p2029_p10)
}
  0x52   : > { %1822 = dma.hbm_to_vmem [thread:$0]  (!%p2625_p6), %s3219_s3, 16, %s2629_s22, [#allocation13]  }
  0x53   : > { %s3220_s5 = sld [smem:[#allocation48_spill]] }
  0x59   : > { %s2033_s28 = scalar_lea.hbm %s3220_s5, 16 }
  0x5a   : > { %p2034_p11 = scmp.ne.s32.totalorder %s3220_s5, %s2033_s28  ;;  %p2040_p0 = scmp.lt.u32.totalorder %s2033_s28, %s3220_s5 }
  0x5c   : > { %p2036_p12 = pnand %p2034_p11, %p2641_p8 }
  0x5e   : > { %p2037_p13 = pneg %p2036_p12 }
  0x60   : > { %p2042_p2 = pnand %p2040_p0, %p2037_p13 }
  0x62   : > { %2045 = shalt.err (!%p2042_p2)
}
  0x63   : > { %s2046_s22 = scalar_lea.vmem %s2631_s25, 16  ;;  %s2053_s0 = scalar_lea.vmem %s2631_s25, 32 }
  0x64   : > { %p2047_p5 = scmp.ne.s32.totalorder %s2631_s25, %s2046_s22  ;;  %p2054_p4 = scmp.lt.s32.totalorder %s2631_s25, %s2631_s25 }
  0x65   : > { %p2055_p10 = scmp.lt.s32.totalorder %s2053_s0, %s2046_s22 }
  0x66   : > { %p2049_p7 = pnand %p2047_p5, %p2641_p8 }
  0x67   : > { %p2056_p11 = por %p2055_p10, %p2054_p4 }
  0x68   : > { %p2050_p9 = pneg %p2049_p7 }
  0x6a   : > { %p2057_p12 = pnand %p2056_p11, %p2050_p9 }
  0x6c   : > { %2060 = shalt.err (!%p2057_p12)
}
  0x6d   : > { %1828 = dma.hbm_to_vmem [thread:$0]  (!%p2625_p6), %s3220_s5, 16, %s2631_s25, [#allocation16]  }
  0x6e   : > { %s2486_s19 = smov [#allocation18]   ;;  %s2487_s28 = smov [#allocation21]  }
  0x6f   : > { %s446_s27 = sshll.u32 %s2486_s19, 4  ;;  %s470_s17 = sshll.u32 %s2487_s28, 4  ;;  %s447_s27 = int_to_ptr.vmem [resolvable:$true] %s446_s27  ;;  %s471_s17 = int_to_ptr.vmem [resolvable:$true] %s470_s17 }
  0x70   : > { %s2061_s18 = scalar_lea.hbm %s3183_s7, 16 }
  0x71   : > { %p2062_p13 = scmp.ne.s32.totalorder %s3183_s7, %s2061_s18  ;;  %p2068_p5 = scmp.lt.u32.totalorder %s2061_s18, %s3183_s7 }
  0x73   : > { %p2064_p0 = pnand %p2062_p13, %p2641_p8 }
  0x75   : > { %p2065_p2 = pneg %p2064_p0 }
  0x77   : > { %p2070_p7 = pnand %p2068_p5, %p2065_p2 }
  0x79   : > { %2073 = shalt.err (!%p2070_p7)
}
  0x7a   : > { %s2074_s25 = scalar_lea.vmem %s447_s27, 16  ;;  %s2081_s29 = scalar_lea.vmem %s447_s27, 32 }
  0x7b   : > { %p2075_p9 = scmp.ne.s32.totalorder %s447_s27, %s2074_s25  ;;  %p2082_p11 = scmp.lt.s32.totalorder %s447_s27, %s447_s27 }
  0x7c   : > { %p2083_p12 = scmp.lt.s32.totalorder %s2081_s29, %s2074_s25 }
  0x7d   : > { %p2077_p4 = pnand %p2075_p9, %p2641_p8 }
  0x7e   : > { %p2084_p1 = por %p2083_p12, %p2082_p11 }
  0x7f   : > { %p2078_p10 = pneg %p2077_p4 }
  0x81   : > { %p2085_p3 = pnand %p2084_p1, %p2078_p10 }
  0x83   : > { %2088 = shalt.err (!%p2085_p3)
}
  0x84   : > { %1834 = dma.hbm_to_vmem [thread:$0]  (!%p2625_p6), %s3183_s7, 16, %s447_s27, [#allocation19]  }
  0x85   : > { %s2089_s14 = scalar_lea.hbm %s3185_s9, 16 }
  0x86   : > { %p2090_p13 = scmp.ne.s32.totalorder %s3185_s9, %s2089_s14  ;;  %p2096_p3 = scmp.lt.u32.totalorder %s2089_s14, %s3185_s9 }
  0x88   : > { %p2092_p0 = pnand %p2090_p13, %p2641_p8 }
  0x8a   : > { %p2093_p1 = pneg %p2092_p0 }
  0x8c   : > { %p2098_p2 = pnand %p2096_p3, %p2093_p1 }
  0x8e   : > { %2101 = shalt.err (!%p2098_p2)
}
  0x8f   : > { %s2102_s25 = scalar_lea.vmem %s471_s17, 16  ;;  %s2109_s27 = scalar_lea.vmem %s471_s17, 32 }
  0x90   : > { %p2103_p5 = scmp.ne.s32.totalorder %s471_s17, %s2102_s25  ;;  %p2110_p4 = scmp.lt.s32.totalorder %s471_s17, %s471_s17 }
  0x91   : > { %p2111_p10 = scmp.lt.s32.totalorder %s2109_s27, %s2102_s25 }
  0x92   : > { %p2105_p7 = pnand %p2103_p5, %p2641_p8 }
  0x93   : > { %p2112_p11 = por %p2111_p10, %p2110_p4 }
  0x94   : > { %p2106_p9 = pneg %p2105_p7 }
  0x96   : > { %p2113_p12 = pnand %p2112_p11, %p2106_p9 }
  0x98   : > { %2116 = shalt.err (!%p2113_p12)
}
  0x99   : > { %1840 = dma.hbm_to_vmem [thread:$0]  (!%p2625_p6), %s3185_s9, 16, %s471_s17, [#allocation22]  }
  0x9a   : > { %s2488_s28 = smov [#allocation24]   ;;  %s2489_s24 = smov [#allocation14]  }
  0x9b   : > { %s494_s26 = sshll.u32 %s2488_s28, 4  ;;  %s410_s14 = sshll.u32 %s2489_s24, 4  ;;  %s495_s26 = int_to_ptr.vmem [resolvable:$true] %s494_s26  ;;  %s411_s14 = int_to_ptr.vmem [resolvable:$true] %s410_s14 }
  0x9c   : > { %s2117_s0 = scalar_lea.hbm %s3187_s11, 16 }
  0x9d   : > { %p2118_p13 = scmp.ne.s32.totalorder %s3187_s11, %s2117_s0  ;;  %p2124_p3 = scmp.lt.u32.totalorder %s2117_s0, %s3187_s11 }
  0x9f   : > { %p2120_p0 = pnand %p2118_p13, %p2641_p8 }
  0xa1   : > { %p2121_p1 = pneg %p2120_p0 }
  0xa3   : > { %p2126_p2 = pnand %p2124_p3, %p2121_p1 }
  0xa5   : > { %2129 = shalt.err (!%p2126_p2)
}
  0xa6   : > { %s2130_s17 = scalar_lea.vmem %s495_s26, 16  ;;  %s2137_s19 = scalar_lea.vmem %s495_s26, 32 }
  0xa7   : > { %p2131_p5 = scmp.ne.s32.totalorder %s495_s26, %s2130_s17  ;;  %p2138_p4 = scmp.lt.s32.totalorder %s495_s26, %s495_s26 }
  0xa8   : > { %p2139_p10 = scmp.lt.s32.totalorder %s2137_s19, %s2130_s17 }
  0xa9   : > { %p2133_p7 = pnand %p2131_p5, %p2641_p8 }
  0xaa   : > { %p2140_p11 = por %p2139_p10, %p2138_p4 }
  0xab   : > { %p2134_p9 = pneg %p2133_p7 }
  0xad   : > { %p2141_p12 = pnand %p2140_p11, %p2134_p9 }
  0xaf   : > { %2144 = shalt.err (!%p2141_p12)
}
  0xb0   : > { %1846 = dma.hbm_to_vmem [thread:$0]  (!%p2625_p6), %s3187_s11, 16, %s495_s26, [#allocation25]  }
  0xb1   : > { %s3221_s4 = sld [smem:[#allocation47_spill]] }
  0xb7   : > { %s2145_s0 = scalar_lea.hbm %s3221_s4, 256 }
  0xb8   : > { %p2146_p13 = scmp.ne.s32.totalorder %s3221_s4, %s2145_s0  ;;  %p2152_p3 = scmp.lt.u32.totalorder %s2145_s0, %s3221_s4 }
  0xba   : > { %p2148_p0 = pnand %p2146_p13, %p2641_p8 }
  0xbc   : > { %p2149_p1 = pneg %p2148_p0 }
  0xbe   : > { %p2154_p2 = pnand %p2152_p3, %p2149_p1 }
  0xc0   : > { %2157 = shalt.err (!%p2154_p2)
}
  0xc1   : > { %s2158_s17 = scalar_lea.vmem %s411_s14, 256  ;;  %p2166_p4 = scmp.lt.s32.totalorder %s411_s14, %s411_s14 }
  0xc2   : > { %p2159_p5 = scmp.ne.s32.totalorder %s411_s14, %s2158_s17  ;;  %p2167_p10 = scmp.lt.s32.totalorder %s2158_s17, %s2158_s17 }
  0xc4   : > { %p2161_p7 = pnand %p2159_p5, %p2641_p8  ;;  %p2168_p11 = por %p2167_p10, %p2166_p4 }
  0xc6   : > { %p2162_p9 = pneg %p2161_p7 }
  0xc8   : > { %p2169_p12 = pnand %p2168_p11, %p2162_p9 }
  0xca   : > { %2172 = shalt.err (!%p2169_p12)
}
  0xcb   : > { %s3222_s26 = smov 64   ;;  %s2490_s24 = smov [#allocation17]  }
  0xcc   : > { %1825 = dma.hbm_to_vmem [thread:$0]  (!%p2625_p6), %s3221_s4, 256, %s411_s14, [#allocation13], %s3222_s26, %s3222_s26, %s2485_s20  }
  0xcd   : > { %s435_s18 = sshll.u32 %s2490_s24, 4  ;;  %s2491_s22 = smov [#allocation20]   ;;  %s436_s18 = int_to_ptr.vmem [resolvable:$true] %s435_s18 }
  0xce   : > { %s456_s0 = sshll.u32 %s2491_s22, 4  ;;  %s3223_s6 = sld [smem:[#allocation49_spill]]  ;;  %s457_s0 = int_to_ptr.vmem [resolvable:$true] %s456_s0 }
  0xd4   : > { %s2173_s27 = scalar_lea.hbm %s3223_s6, 16 }
  0xd5   : > { %p2174_p13 = scmp.ne.s32.totalorder %s3223_s6, %s2173_s27  ;;  %p2180_p3 = scmp.lt.u32.totalorder %s2173_s27, %s3223_s6 }
  0xd7   : > { %p2176_p0 = pnand %p2174_p13, %p2641_p8 }
  0xd9   : > { %p2177_p1 = pneg %p2176_p0 }
  0xdb   : > { %p2182_p2 = pnand %p2180_p3, %p2177_p1 }
  0xdd   : > { %2185 = shalt.err (!%p2182_p2)
}
  0xde   : > { %s2186_s14 = scalar_lea.vmem %s436_s18, 16  ;;  %s2193_s28 = scalar_lea.vmem %s436_s18, 32 }
  0xdf   : > { %p2187_p5 = scmp.ne.s32.totalorder %s436_s18, %s2186_s14  ;;  %p2194_p4 = scmp.lt.s32.totalorder %s436_s18, %s436_s18 }
  0xe0   : > { %p2195_p10 = scmp.lt.s32.totalorder %s2193_s28, %s2186_s14 }
  0xe1   : > { %p2189_p7 = pnand %p2187_p5, %p2641_p8 }
  0xe2   : > { %p2196_p11 = por %p2195_p10, %p2194_p4 }
  0xe3   : > { %p2190_p9 = pneg %p2189_p7 }
  0xe5   : > { %p2197_p12 = pnand %p2196_p11, %p2190_p9 }
  0xe7   : > { %2200 = shalt.err (!%p2197_p12)
}
  0xe8   : > { %1831 = dma.hbm_to_vmem [thread:$0]  (!%p2625_p6), %s3223_s6, 16, %s436_s18, [#allocation16]  }
  0xe9   : > { %s2201_s25 = scalar_lea.hbm %s3184_s8, 256 }
  0xea   : > { %p2202_p13 = scmp.ne.s32.totalorder %s3184_s8, %s2201_s25  ;;  %p2208_p3 = scmp.lt.u32.totalorder %s2201_s25, %s3184_s8 }
  0xec   : > { %p2204_p0 = pnand %p2202_p13, %p2641_p8 }
  0xee   : > { %p2205_p1 = pneg %p2204_p0 }
  0xf0   : > { %p2210_p2 = pnand %p2208_p3, %p2205_p1 }
  0xf2   : > { %2213 = shalt.err (!%p2210_p2)
}
  0xf3   : > { %s2214_s14 = scalar_lea.vmem %s457_s0, 256  ;;  %p2222_p4 = scmp.lt.s32.totalorder %s457_s0, %s457_s0 }
  0xf4   : > { %p2215_p5 = scmp.ne.s32.totalorder %s457_s0, %s2214_s14  ;;  %p2223_p10 = scmp.lt.s32.totalorder %s2214_s14, %s2214_s14 }
  0xf6   : > { %p2217_p7 = pnand %p2215_p5, %p2641_p8  ;;  %p2224_p11 = por %p2223_p10, %p2222_p4 }
  0xf8   : > { %p2218_p9 = pneg %p2217_p7 }
  0xfa   : > { %p2225_p12 = pnand %p2224_p11, %p2218_p9 }
  0xfc   : > { %2228 = shalt.err (!%p2225_p12)
}
  0xfd   : > { %1837 = dma.hbm_to_vmem [thread:$0]  (!%p2625_p6), %s3184_s8, 256, %s457_s0, [#allocation19], %s3222_s26, %s3222_s26, %s2485_s20  }
  0xfe   : > { %s2492_s24 = smov [#allocation23]   ;;  %s2493_s2 = smov [#allocation26]  }
  0xff   : > { %s480_s22 = sshll.u32 %s2492_s24, 4  ;;  %s505_s1 = sshll.u32 %s2493_s2, 4  ;;  %s481_s22 = int_to_ptr.vmem [resolvable:$true] %s480_s22  ;;  %s506_s1 = int_to_ptr.vmem [resolvable:$true] %s505_s1 }
 0x100   : > { %s2229_s29 = scalar_lea.hbm %s3186_s10, 512 }
 0x101   : > { %p2230_p13 = scmp.ne.s32.totalorder %s3186_s10, %s2229_s29  ;;  %p2236_p3 = scmp.lt.u32.totalorder %s2229_s29, %s3186_s10 }
 0x103   : > { %p2232_p0 = pnand %p2230_p13, %p2641_p8 }
 0x105   : > { %p2233_p1 = pneg %p2232_p0 }
 0x107   : > { %p2238_p2 = pnand %p2236_p3, %p2233_p1 }
 0x109   : > { %2241 = shalt.err (!%p2238_p2)
}
 0x10a   : > { %s2242_s0 = scalar_lea.vmem %s481_s22, 512  ;;  %p2250_p4 = scmp.lt.s32.totalorder %s481_s22, %s481_s22 }
 0x10b   : > { %p2243_p5 = scmp.ne.s32.totalorder %s481_s22, %s2242_s0  ;;  %p2251_p10 = scmp.lt.s32.totalorder %s2242_s0, %s2242_s0 }
 0x10d   : > { %p2245_p7 = pnand %p2243_p5, %p2641_p8  ;;  %p2252_p11 = por %p2251_p10, %p2250_p4 }
 0x10f   : > { %p2246_p9 = pneg %p2245_p7 }
 0x111   : > { %p2253_p12 = pnand %p2252_p11, %p2246_p9 }
 0x113   : > { %2256 = shalt.err (!%p2253_p12)
}
 0x114   : > { %1843 = dma.hbm_to_vmem [thread:$0]  (!%p2625_p6), %s3186_s10, 512, %s481_s22, [#allocation22], %s3222_s26, %s3222_s26, %s2485_s20  }
 0x115   : > { %s2257_s27 = scalar_lea.hbm %s3188_s12, 16 }
 0x116   : > { %p2258_p13 = scmp.ne.s32.totalorder %s3188_s12, %s2257_s27  ;;  %p2264_p3 = scmp.lt.u32.totalorder %s2257_s27, %s3188_s12 }
 0x118   : > { %p2260_p0 = pnand %p2258_p13, %p2641_p8 }
 0x11a   : > { %p2261_p1 = pneg %p2260_p0 }
 0x11c   : > { %p2266_p2 = pnand %p2264_p3, %p2261_p1 }
 0x11e   : > { %2269 = shalt.err (!%p2266_p2)
}
 0x11f   : > { %s2270_s18 = scalar_lea.vmem %s506_s1, 16  ;;  %s2277_s20 = scalar_lea.vmem %s506_s1, 32 }
 0x120   : > { %p2271_p5 = scmp.ne.s32.totalorder %s506_s1, %s2270_s18  ;;  %p2278_p4 = scmp.lt.s32.totalorder %s506_s1, %s506_s1 }
 0x121   : > { %p2279_p10 = scmp.lt.s32.totalorder %s2277_s20, %s2270_s18 }
 0x122   : > { %p2273_p7 = pnand %p2271_p5, %p2641_p8 }
 0x123   : > { %p2280_p11 = por %p2279_p10, %p2278_p4 }
 0x124   : > { %p2274_p9 = pneg %p2273_p7 }
 0x126   : > { %p2281_p12 = pnand %p2280_p11, %p2274_p9 }
 0x128   : > { %2284 = shalt.err (!%p2281_p12)
}
 0x129   : > { %1849 = dma.hbm_to_vmem [thread:$0]  (!%p2625_p6), %s3188_s12, 16, %s506_s1, [#allocation25]  }
 0x12a   : > { %s2494_s0 = smov [#allocation27]   ;;  %s2285_s25 = scalar_lea.hbm %s3189_s13, 16 }
 0x12b   : > { %s516_s28 = sshll.u32 %s2494_s0, 4  ;;  %p2286_p13 = scmp.ne.s32.totalorder %s3189_s13, %s2285_s25  ;;  %s517_s28 = int_to_ptr.vmem [resolvable:$true] %s516_s28 }
 0x12c   : > { %p2292_p3 = scmp.lt.u32.totalorder %s2285_s25, %s3189_s13 }
 0x12d   : > { %p2288_p0 = pnand %p2286_p13, %p2641_p8 }
 0x12f   : > { %p2289_p1 = pneg %p2288_p0 }
 0x131   : > { %p2294_p2 = pnand %p2292_p3, %p2289_p1 }
 0x133   : > { %2297 = shalt.err (!%p2294_p2)
}
 0x134   : > { %s2298_s1 = scalar_lea.vmem %s517_s28, 16  ;;  %s2305_s14 = scalar_lea.vmem %s517_s28, 32 }
 0x135   : > { %p2299_p5 = scmp.ne.s32.totalorder %s517_s28, %s2298_s1  ;;  %p2306_p4 = scmp.lt.s32.totalorder %s517_s28, %s517_s28 }
 0x136   : > { %p2307_p10 = scmp.lt.s32.totalorder %s2305_s14, %s2298_s1 }
 0x137   : > { %p2301_p7 = pnand %p2299_p5, %p2641_p8 }
 0x138   : > { %p2308_p11 = por %p2307_p10, %p2306_p4 }
 0x139   : > { %p2302_p9 = pneg %p2301_p7 }
 0x13b   : > { %p2309_p12 = pnand %p2308_p11, %p2302_p9 }
 0x13d   : > { %2312 = shalt.err (!%p2309_p12)
}
 0x13e   : > { %s3224_s21 = sld [smem:[#allocation40_spill]]  ;;  %s3225_s26 = sld [smem:[#allocation41_spill]] }
 0x13f   : > { %1852 = dma.hbm_to_vmem [thread:$0]  (!%p2625_p6), %s3189_s13, 16, %s517_s28, [#allocation28]  }
 0x140   : > { %s1604_s22 = sadd.s32 4294967294, %s2475_s16   ;;  %s2886_s23 = sadd.s32 1, %s2475_s16  }
 0x141   : > { %s43_s0 = ssub.s32 %s2475_s16, %s2886_s23  ;;  %s46_s24 = sadd.s32 1, %s2471_s15 }
 0x142   : > { %p44_p8 = scmp.eq.s32.totalorder %s43_s0, 0  ;;  %p53_p13 = scmp.ne.s32.totalorder %s2471_s15, %s2467_s30 }
 0x143   : > { %p54_p0 = scmp.eq.s32.totalorder %s2475_s16, 0  ;;  %p367_p7 = scmp.eq.s32.totalorder %s1604_s22, 1 }
 0x144   : > { %p59_p1 = scmp.ne.s32.totalorder %s2467_s30, %s3224_s21  ;;  %p3227_p2 = scmp.eq.s32.totalorder %s3225_s26, 0 }
 0x145   : > { %s2897_s2 = scalar_select %p44_p8, %s2471_s15, %s46_s24  }
 0x146   : > { %p2899_p3 = por %p54_p0, %p53_p13  ;;  %p2905_p6 = por %p3227_p2, %p59_p1 }
 0x147   : > { %p361_p5 = scmp.eq.s32.totalorder %s3225_s26, 1  ;;  %p1876_p9 = scmp.lt.s32.totalorder %s2475_s16, 2 }
 0x148   : > { %s3228_s28 = scalar_select %p2905_p6, 1, 0 }
 0x149   : > { %s2912_s27 = sand.u32 1, %s2471_s15   ;;  %p2914_p4 = por %p361_p5, %p53_p13 }
 0x14a   : > { %p2918_p10 = por %p367_p7, %p59_p1  ;;  %s1619_s19 = sshll.u32 %s2912_s27, 2 }
 0x14b   : > { %s3229_s29 = scalar_select %p2914_p4, 1, 0 }
 0x14c   : > { %s3230_s17 = scalar_select %p2918_p10, 1, 0 }
 0x14d   : > { %s1620_s1 = sshll.u32 %s2475_s16, 6  ;;  %s3231_s20 = sld [smem:[#allocation43_spill]] }
 0x14e   : > { %s531_s26 = scalar_lea.vmem [#allocation6], %s1619_s19  ;;  %p2933_p11 = pnand %p1876_p9, %p2899_p3 }
 0x14f   : > { %s538_s22 = sshll.u32 %s531_s26, 4  ;;  %s528_s3 = scalar_lea.sflag [#allocation7], %s2912_s27  ;;  %s2929_s22 = int_to_ptr.vmem [resolvable:$true] %s538_s22 }
 0x150   : > { %p2315_p8 = pneg %p2933_p11 }
 0x153   : > { %s2927_s21 = scalar_lea.hbm %s3231_s20, %s1620_s1  ;;  %s2318_s25 = scalar_lea.hbm %s3231_s20, 128 }
 0x154   : > { %s2313_s14 = scalar_lea.hbm %s2927_s21, 64  ;;  %p2319_p1 = scmp.lt.u32.totalorder %s2927_s21, %s3231_s20 }
 0x155   : > { %p2314_p12 = scmp.ne.s32.totalorder %s2927_s21, %s2313_s14  ;;  %p2320_p3 = scmp.lt.u32.totalorder %s2318_s25, %s2313_s14 }
 0x156   : > { %p2322_p5 = scmp.lt.u32.totalorder %s2313_s14, %s2927_s21 }
 0x157   : > { %p2316_p13 = pnand %p2315_p8, %p2314_p12  ;;  %p2321_p2 = por %p2320_p3, %p2319_p1 }
 0x159   : > { %p2317_p0 = pneg %p2316_p13  ;;  %p2323_p7 = por %p2322_p5, %p2321_p2 }
 0x15b   : > { %p2324_p9 = pnand %p2323_p7, %p2317_p0 }
 0x15d   : > { %2327 = shalt.err (!%p2324_p9)
}
 0x15e   : > { %s2328_s24 = scalar_lea.vmem %s2929_s22, 64  ;;  %s2495_s19 = smov [#allocation6]  }
 0x15f   : > { %p2329_p12 = scmp.ne.s32.totalorder %s2929_s22, %s2328_s24  ;;  %s2333_s1 = sshll.u32 %s2495_s19, 4  ;;  %s2334_s1 = int_to_ptr.vmem [resolvable:$false] %s2333_s1 }
 0x160   : > { %s2335_s18 = scalar_lea.vmem %s2334_s1, 128  ;;  %p2336_p4 = scmp.lt.s32.totalorder %s2929_s22, %s2334_s1 }
 0x161   : > { %p2331_p13 = pnand %p2329_p12, %p2315_p8  ;;  %p2337_p1 = scmp.lt.s32.totalorder %s2335_s18, %s2328_s24 }
 0x163   : > { %p2332_p10 = pneg %p2331_p13  ;;  %p2338_p3 = por %p2337_p1, %p2336_p4 }
 0x165   : > { %p2339_p2 = pnand %p2338_p3, %p2332_p10 }
 0x167   : > { %2342 = shalt.err (!%p2339_p2)
}
 0x168   : > { %1856 = dma.hbm_to_vmem [thread:$0]  (!%p2933_p11), %s2927_s21, 64, %s2929_s22, %s528_s3  }
 0x169   : > { %s1621_s14 = sshll.u32 %s2475_s16, 4  ;;  %s548_s25 = scalar_lea.vmem [#allocation9], %s2912_s27 }
 0x16a   : > { %s555_s26 = sshll.u32 %s548_s25, 4  ;;  %s3233_s5 = sld [smem:[#allocation44_spill]]  ;;  %s556_s26 = int_to_ptr.vmem [resolvable:$true] %s555_s26 }
 0x16b   : > { %s3234_s24 = sand.u32 1, %s2475_s16  }
 0x16c   : > { %s546_s18 = scalar_lea.sflag [#allocation10], %s3234_s24 }
 0x170   : > { %s2969_s1 = scalar_lea.hbm %s3233_s5, %s1621_s14  ;;  %s2348_s21 = scalar_lea.hbm %s3233_s5, 32 }
 0x171   : > { %s2343_s6 = scalar_lea.hbm %s2969_s1, 16  ;;  %p2349_p5 = scmp.lt.u32.totalorder %s2969_s1, %s3233_s5 }
 0x172   : > { %p2344_p4 = scmp.ne.s32.totalorder %s2969_s1, %s2343_s6  ;;  %p2350_p7 = scmp.lt.u32.totalorder %s2348_s21, %s2343_s6 }
 0x173   : > { %p2352_p12 = scmp.lt.u32.totalorder %s2343_s6, %s2969_s1 }
 0x174   : > { %p2346_p10 = pnand %p2344_p4, %p2315_p8  ;;  %p2351_p9 = por %p2350_p7, %p2349_p5 }
 0x176   : > { %p2347_p0 = pneg %p2346_p10  ;;  %p2353_p13 = por %p2352_p12, %p2351_p9 }
 0x178   : > { %p2354_p1 = pnand %p2353_p13, %p2347_p0 }
 0x17a   : > { %2357 = shalt.err (!%p2354_p1)
}
 0x17b   : > { %s2358_s14 = scalar_lea.vmem %s556_s26, 16  ;;  %s2496_s25 = smov [#allocation9]  }
 0x17c   : > { %p2359_p3 = scmp.ne.s32.totalorder %s556_s26, %s2358_s14  ;;  %s2363_s19 = sshll.u32 %s2496_s25, 4  ;;  %s2364_s19 = int_to_ptr.vmem [resolvable:$false] %s2363_s19 }
 0x17d   : > { %s2365_s24 = scalar_lea.vmem %s2364_s19, 32  ;;  %p2366_p10 = scmp.lt.s32.totalorder %s556_s26, %s2364_s19 }
 0x17e   : > { %p2361_p2 = pnand %p2359_p3, %p2315_p8  ;;  %p2367_p6 = scmp.lt.s32.totalorder %s2365_s24, %s2358_s14 }
 0x180   : > { %p2362_p4 = pneg %p2361_p2  ;;  %p2368_p5 = por %p2367_p6, %p2366_p10 }
 0x182   : > { %p2369_p7 = pnand %p2368_p5, %p2362_p4 }
 0x184   : > { %2372 = shalt.err (!%p2369_p7)
}
 0x185   : > { %1859 = dma.hbm_to_vmem [thread:$0]  (!%p2933_p11), %s2969_s1, 16, %s556_s26, %s546_s18  }
 0x186   : > { %s3235_s6 = sld [smem:[#allocation42_spill]] }
 0x18c   : > { %p3236_p0 = scmp.ne.s32.totalorder %s3235_s6, 0 }
 0x18d   : > { %s2995_s3 = sand.u32 (!%p3236_p0), 1, %s2467_s30   ;;  %p3237_p6 = scmp.ne.s32.totalorder (!%p3236_p0), %s3228_s28, 0 }
 0x18e   : > { %564 = sbr.rel (%p3236_p0) target bundleno = 2888 (0xb48), region = 76  ;;  %s1623_s27 = sshll.u32 (!%p3236_p0), %s2995_s3, 2 }
 0x18f   : > { %s567_s21 = scalar_lea.sflag (!%p3236_p0), [#allocation7], %s2995_s3  ;;  %s570_s4 = scalar_lea.vmem (!%p3236_p0), [#allocation6], %s1623_s27 }
 0x195   : > { %2422 = dma.done.wait (%p3237_p6), %s567_s21, 64  }
 0x196   : > { %2424 = vsyncadd (%p3237_p6), %s567_s21, 4294967232  ;;  %s3238_s0 = sld [smem:[#allocation41_spill]]  ;;  %s578_s18 = scalar_lea.vmem [#allocation9], %s2995_s3 }
 0x19c   : > { %s575_s26 = sand.u32 1, %s3238_s0  }
 0x19d   : > { %s576_s1 = scalar_lea.sflag [#allocation10], %s575_s26 }
 0x19e   : > { %2426 = dma.done.wait (%p3237_p6), %s576_s1, 16  }
 0x19f   : > { %2428 = vsyncadd (%p3237_p6), %s576_s1, 4294967280  ;;  %p3239_p11 = scmp.eq.s32.totalorder %s3238_s0, 0 }
 0x1a1   : > { %2430 = dma.done.wait (%p3239_p11), [#allocation10], 256   ;;  %p3240_p8 = pmov %p3239_p11 }
 0x1a3   : > { %2432 = vsyncadd (%p3240_p8), [#allocation10], 4294967040  ;;  %p3241_p9 = pmov %p3240_p8 }
 0x1a4   : > { %p3242_p12 = pmov %p3240_p8 }
 0x1a5   : > { %2434 = dma.done.wait (%p3241_p9), [#allocation13], 272  }
 0x1a6   : > { %2436 = vsyncadd (%p3242_p12), [#allocation13], 4294967024  ;;  %p3243_p13 = pmov %p3240_p8 }
 0x1a7   : > { %p3244_p1 = pmov %p3240_p8 }
 0x1a8   : > { %2438 = dma.done.wait (%p3243_p13), [#allocation16], 32  }
 0x1a9   : > { %2440 = vsyncadd (%p3244_p1), [#allocation16], 4294967264  ;;  %p3245_p3 = pmov %p3244_p1 }
 0x1aa   : > { %p3246_p2 = pmov %p3244_p1 }
 0x1ab   : > { %2442 = dma.done.wait (%p3245_p3), [#allocation19], 272  }
 0x1ac   : > { %2444 = vsyncadd (%p3246_p2), [#allocation19], 4294967024  ;;  %p3247_p4 = pmov %p3244_p1 }
 0x1ad   : > { %p3248_p10 = pmov %p3244_p1 }
 0x1ae   : > { %2446 = dma.done.wait (%p3247_p4), [#allocation22], 528  }
 0x1af   : > { %2448 = vsyncadd (%p3248_p10), [#allocation22], 4294966768  ;;  %p3249_p5 = pmov %p3244_p1 }
 0x1b0   : > { %p3250_p7 = pmov %p3244_p1 }
 0x1b1   : > { %2450 = dma.done.wait (%p3249_p5), [#allocation25], 32  }
 0x1b2   : > { %2452 = vsyncadd (%p3250_p7), [#allocation25], 4294967264  ;;  %p3251_p0 = pmov %p3244_p1 }
 0x1b4   : > { %2454 = dma.done.wait (%p3251_p0), [#allocation28], 16   ;;  %p3252_p6 = pmov %p3251_p0 }
 0x1b5   : > { %v2497_v0 = vmov 0.0   ;;  %vm2498_vm0 = vmmov 0   ;;  %v3042_v1 = vld [vmem:[%s578_s18] ss:$0 sm:$0xff]  ;;  %v1959_v2 = vld [vmem:[#allocation11] sm:$0xff]   ;;  %v1960_v4 = vld [vmem:[#allocation11 + $0x8] sm:$0xff]  }
 0x1b6   : > { %2456 = vsyncadd (%p3252_p6), [#allocation28], 4294967280  ;;  %1698 = vmatprep.subr.bf16.mxu0 %v2497_v0  ;;  %1702 = vmatprep.mubr.msk.bf16.mxu0 %vm2498_vm0, %v2497_v0  ;;  %v3044_v3 = vld [vmem:[%s570_s4] sm:$0xf]  ;;  %vm701_vm1 = vcmask 261120   ;;  %vm747_vm2 = vcmask 60416  }
 0x1b7   : > { %1699 = vmatpush3.bf16.msra.mxu0 %v1959_v2  ;;  %v677_v5 = vunpack.c.l.bf16 %v3044_v3  ;;  %v1637_v6 = vld [vmem:[#allocation12] ss:$0 sm:$0xff]  ;;  %s2499_s28 = smov 88   ;;  %s2500_s22 = smov 96  }
 0x1b8   : > { %1700 = vmatprep.subr.bf16.mxu0 %v2497_v0  ;;  %s2501_s14 = smov 48   ;;  %s2502_s25 = smov 64  }
 0x1b9   : > { %s2503_s19 = smov 56   ;;  %s2504_s24 = smov 120  }
 0x1ba   : > { %s2505_s6 = smov 80   ;;  %s2506_s21 = smov 112  }
 0x1bb   : > { %1701 = vmatpush3.bf16.msra.mxu0 %v1960_v4  ;;  %s2507_s4 = smov 104   ;;  %s2508_s0 = smov 72  }
 0x1bc   : > { %s2509_s26 = smov 40   ;;  %s3064_s1 = scalar_lea.vmem [#allocation29], %s1623_s27 }
 0x1bd   : > { %s3066_s18 = smov 0  }
 0x1be   : > { %1703 = vmatmul.mubr.msk.bf16.vlgmr.msra.gmra.mrb[0].mxu0 %vm701_vm1, %v3044_v3 }
 0x291   : > { %v739_v7 = vpop.f32.mrb[0].mxu0 }
 0x292   : > { %v740_v8 = vadd.f32 %v1637_v6, %v739_v7  ;;  %v1704_v9 = vpop.f32.mrb[1].mxu0 }
 0x293   : > { %v742_v10 = vpop.f32.mrb[2].mxu0 }
 0x294   : > { %v745_v11 = vmul.f32 0.35355338, %v740_v8  ;;  %v1673_v12 = vpack.c.bf16 %v740_v8, %v740_v8  ;;  %v1705_v13 = vpop.f32.mrb[3].mxu0 }
 0x296   : > { %v746_v14 = vpack.c.bf16 %v745_v11, %v745_v11  ;;  %769 = vrot.lane.b32.xlu1 %v1673_v12, %s2499_s28  ;;  %753 = vrot.lane.b32.xlu0 %v1673_v12, %s2500_s22 }
 0x298   : > { %748 = vst.msk [vmem:[#allocation2] sm:$0xf] %vm747_vm2, %v746_v14 }
 0x29a   : > { %789 = vrot.lane.b32.xlu1 %v1673_v12, %s2501_s14  ;;  %757 = vrot.lane.b32.xlu0 %v1673_v12, %s2502_s25 }
 0x29e   : > { %774 = vrot.lane.b32.xlu0 %v1673_v12, %s2503_s19  ;;  %764 = vrot.lane.b32.xlu1 %v746_v14, %s2504_s24 }
 0x2a2   : > { %784 = vrot.lane.b32.xlu0 %v1673_v12, %s2505_s6  ;;  %779 = vrot.lane.b32.xlu1 %v746_v14, %s2506_s21 }
 0x2a6   : > { %794 = vrot.lane.b32.xlu0 %v746_v14, %s2507_s4  ;;  %799 = vrot.lane.b32.xlu1 %v1673_v12, %s2508_s0 }
 0x2aa   : > { %804 = vrot.lane.b32.xlu0 %v1673_v12, %s2509_s26 }
 0x308   : > { %v770_v15 = vpop.permute.xlu1 %769  ;;  %v754_v16 = vpop.permute.xlu0 %753 }
 0x309   : > { %773 = vst.msk [vmem:[#allocation3 + $0x4] sm:$0xf] %vm747_vm2, %v770_v15  ;;  %756 = vst.msk [vmem:[#allocation3] sm:$0xf] %vm747_vm2, %v754_v16 }
 0x30c   : > { %v790_v17 = vpop.permute.xlu1 %789  ;;  %v758_v18 = vpop.permute.xlu0 %757 }
 0x30d   : > { %793 = vst.msk [vmem:[#allocation4 + $0x8] sm:$0xf] %vm747_vm2, %v790_v17  ;;  %760 = vst.msk [vmem:[#allocation4] sm:$0xf] %vm747_vm2, %v758_v18 }
 0x310   : > { %v775_v19 = vpop.permute.xlu0 %774  ;;  %v765_v20 = vpop.permute.xlu1 %764 }
 0x311   : > { %778 = vst.msk [vmem:[#allocation4 + $0x4] sm:$0xf] %vm747_vm2, %v775_v19  ;;  %768 = vst.msk [vmem:[#allocation2 + $0x4] sm:$0xf] %vm747_vm2, %v765_v20 }
 0x314   : > { %v785_v21 = vpop.permute.xlu0 %784  ;;  %v780_v22 = vpop.permute.xlu1 %779 }
 0x315   : > { %788 = vst.msk [vmem:[#allocation3 + $0x8] sm:$0xf] %vm747_vm2, %v785_v21  ;;  %783 = vst.msk [vmem:[#allocation2 + $0x8] sm:$0xf] %vm747_vm2, %v780_v22 }
 0x318   : > { %v795_v23 = vpop.permute.xlu0 %794  ;;  %v800_v24 = vpop.permute.xlu1 %799 }
 0x319   : > { %798 = vst.msk [vmem:[#allocation2 + $0xc] sm:$0xf] %vm747_vm2, %v795_v23  ;;  %803 = vst.msk [vmem:[#allocation3 + $0xc] sm:$0xf] %vm747_vm2, %v800_v24 }
 0x31c   : > { %v805_v25 = vpop.permute.xlu0 %804 }
 0x31d   : > { %808 = vst.msk [vmem:[#allocation4 + $0xc] sm:$0xf] %vm747_vm2, %v805_v25 }
 0x31e LB: >> { %v2510_v26 = vmov 0.0   ;;  %vm2511_vm3 = vmmov 0   ;;  %s3072_s28 = sshll.u32 %s2479_s18, 2  ;;  %vm831_vm4 = vcmask 64512   ;;  %vm893_vm5 = vcmask 1043456   ;;  %s821_s18 = sadd.s32 1, %s2479_s18   ;;  %s2479_s18 = sphi %s3066_s18, %s821_s18  }
 0x31f   : >> { %1706 = vmatprep.subr.bf16.mxu0 %v2510_v26  ;;  %1708 = vmatprep.mubr.msk.bf16.mxu0 %vm2511_vm3, %v2510_v26  ;;  %s826_s27 = scalar_lea.vmem [#allocation3], %s3072_s28  ;;  %s823_s22 = scalar_lea.vmem [#allocation2], %s3072_s28 }
 0x320   : >> { %1712 = vmatprep.subr.bf16.mxu1 %v2510_v26  ;;  %1714 = vmatprep.mubr.msk.bf16.mxu1 %vm2511_vm3, %v2510_v26  ;;  %v827_v27 = vld [vmem:[%s826_s27] sm:$0xf]  ;;  %s829_s14 = scalar_lea.vmem [#allocation4], %s3072_s28  ;;  %s939_s25 = scalar_lea.vmem [#allocation5], %s3072_s28 }
 0x321   : >> { %v836_v28 = vsel %vm831_vm4, %v827_v27, 0  ;;  %v824_v29 = vld [vmem:[%s823_s22] sm:$0xf]  ;;  %p818_p11 = scmp.ge.s32.totalorder %s821_s18, 4  }
 0x322   : >> { %1707 = vmatpush3.bf16.xpose.msra.mxu0 %v836_v28  ;;  %v943_v52 = vld [vmem:[#allocation14] sm:$0xf] (%p818_p11)  ;;  %v1001_v53 = vld [vmem:[#allocation14 + $0x4] sm:$0xf] (%p818_p11)  ;;  %v1051_v56 = vld [vmem:[#allocation14 + $0x8] sm:$0xf] (%p818_p11) }
 0x323   : > { %1718 = vmatprep.subr.bf16.mxu0 (%p818_p11), %v2497_v0  ;;  %v950_v54 = vsel (%p818_p11), %vm893_vm5, %v943_v52, 0  ;;  %v1006_v55 = vsel (%p818_p11), %vm893_vm5, %v1001_v53, 0  ;;  %v1101_v59 = vld [vmem:[#allocation14 + $0xc] sm:$0xf] (%p818_p11)  ;;  %v1056_v60 = vsel (%p818_p11), %vm893_vm5, %v1051_v56, 0  ;;  %vm1296_vm6 = vcmask (%p818_p11), 523264  }
 0x324   : >> { %v830_v41 = vld [vmem:[%s829_s14] sm:$0xf]  ;;  %v1106_v61 = vsel (%p818_p11), %vm893_vm5, %v1101_v59, 0  ;;  %s3253_s19 = sld [smem:[#allocation41_spill]] (%p818_p11)  ;;  %s1387_s6 = sshll.u32 (%p818_p11), %s3064_s1, 4  ;;  %vm1371_vm7 = vcmask (%p818_p11), 257024   ;;  %s3133_s6 = int_to_ptr.vmem [resolvable:$true] %s1387_s6 }
 0x325   : >> { %v895_v42 = vsel %vm893_vm5, %v830_v41, 0  ;;  %v1967_v41 = vld [vmem:[#allocation23] sm:$0xff] (%p818_p11)   ;;  %s3254_s0 = sld [smem:[#allocation50_spill]] (%p818_p11)  ;;  %s1374_s18 = scalar_lea.sflag (%p818_p11), [#allocation8], %s2995_s3 }
 0x326   : >> { %1713 = vmatpush3.bf16.msra.mxu1 %v895_v42  ;;  %v1968_v42 = vld [vmem:[#allocation23 + $0x8] sm:$0xff] (%p818_p11)   ;;  %s2373_s28 = scalar_lea.vmem (%p818_p11), %s3133_s6, 64  ;;  %p3255_p9 = scmp.ne.s32.totalorder (%p818_p11), %s3229_s29, 0 }
 0x327   : > { %1724 = vmatprep.subr.bf16.mxu1 (%p818_p11), %v2497_v0  ;;  %p2374_p8 = scmp.ne.s32.totalorder (%p818_p11), %s3133_s6, %s2373_s28  ;;  %s2512_s27 = smov (%p818_p11), [#allocation29]  }
 0x328   : > { %s2377_s22 = sshll.u32 (%p818_p11), %s2512_s27, 4  ;;  %s2378_s22 = int_to_ptr.vmem [resolvable:$false] %s2377_s22 }
 0x329   : >> { %1709 = vmatmul.mubr.msk.bf16.vlgmr.msra.gmra.mrb[0].mxu0 %vm831_vm4, %v824_v29  ;;  %p2375_p12 = pnand (%p818_p11), %p2374_p8, %p3255_p9  ;;  %s2379_s14 = scalar_lea.vmem (%p818_p11), %s2378_s22, 128 }
 0x32a   : > { %1720 = vmatprep.mubr.msk.bf16.mxu0 (%p818_p11), %vm2498_vm0, %v2497_v0  ;;  %1719 = vmatpush3.bf16.msra.mxu0 (%p818_p11), %v950_v54  ;;  %s1670_s24 = sshll.u32 (%p818_p11), %s3253_s19, 6  ;;  %p2380_p1 = scmp.lt.s32.totalorder (%p818_p11), %s3133_s6, %s2378_s22 }
 0x32b   : > { %1730 = vmatprep.subr.bf16.mxu0 (%p818_p11), %v2497_v0  ;;  %s3131_s26 = scalar_lea.hbm (%p818_p11), %s3254_s0, %s1670_s24  ;;  %p2376_p13 = pneg (%p818_p11), %p2375_p12 }
 0x32c   : > { %p2381_p3 = scmp.lt.s32.totalorder (%p818_p11), %s2379_s14, %s2373_s28 }
 0x32e   : > { %p2382_p2 = por (%p818_p11), %p2381_p3, %p2380_p1 }
 0x330   : > { %p2383_p4 = pnand (%p818_p11), %p2382_p2, %p2376_p13 }
 0x3fc   : >> { %v872_v30 = vpop.f32.mrb[0].mxu0 }
 0x3fd   : >> { %v873_v31 = vadd.f32 %v3042_v1, %v872_v30  ;;  %v1710_v32 = vpop.f32.mrb[1].mxu0  ;;  %v1651_v1 = vld [vmem:[#allocation15] ss:$0 sm:$0xff] (%p818_p11) }
 0x3fe   : >> { %v875_v33 = vpop.f32.mrb[2].mxu0  ;;  %v1966_v32 = vld [vmem:[#allocation20 + $0x8] sm:$0xff] (%p818_p11)  }
 0x3ff   : >> { %v1711_v34 = vpop.f32.mrb[3].mxu0  ;;  %v878_v35 = vsel %vm831_vm4, %v873_v31, -inf }
 0x400   : >> { %879 = vmax.xlane.f32.xlu0 %v878_v35  ;;  %v1655_v35 = vld [vmem:[#allocation17] ss:$0 sm:$0xff] (%p818_p11) }
 0x48d   : >> { %v880_v36 = vpop.xlane.xlu0 %879 }
 0x48e   : >> { %v881_v37 = vsub.f32 %v873_v31, %v880_v36  ;;  %v1965_v31 = vld [vmem:[#allocation20] sm:$0xff] (%p818_p11)  }
 0x490   : >> { %v882_v38 = vmul.f32 1.442695, %v881_v37  ;;  %v1656_v37 = vld [vmem:[#allocation18] ss:$0 sm:$0xff] (%p818_p11) }
 0x492   : >> { %1961 = vpow2.f32 %v882_v38 }
 0x49c   : >> { %v1962_v39 = vpop.eup %1961 }
 0x49d   : >> { %v884_v40 = vsel %vm831_vm4, %v1962_v39, 0.0 }
 0x49e   : >> { %885 = vadd.xlane.f32.xlu0 %v884_v40 }
 0x52b   : >> { %v886_v43 = vpop.xlane.xlu0 %885 }
 0x52c   : >> { %1963 = vrcp.f32 %v886_v43  ;;  %v1969_v43 = vld [vmem:[#allocation23 + $0x10] sm:$0xff] (%p818_p11)  }
 0x536   : >> { %v1964_v44 = vpop.eup %1963 }
 0x537   : >> { %v888_v45 = vmul.f32 %v1964_v44, %v1962_v39  ;;  %v1970_v44 = vld [vmem:[#allocation23 + $0x18] sm:$0xff] (%p818_p11)  }
 0x539   : >> { %v889_v46 = vpack.c.bf16 %v888_v45, %v888_v45  ;;  %v1657_v45 = vld [vmem:[#allocation21] ss:$0 sm:$0xff] (%p818_p11) }
 0x53b   : >> { %1715 = vmatmul.mubr.msk.bf16.vlgmr.msra.gmra.mrb[0].mxu1 %vm831_vm4, %v889_v46 }
 0x53c   : > { %1726 = vmatprep.mubr.msk.bf16.mxu1 (%p818_p11), %vm2498_vm0, %v2497_v0  ;;  %1725 = vmatpush3.bf16.msra.mxu1 (%p818_p11), %v1006_v55 }
 0x53d   : > { %1736 = vmatprep.subr.bf16.mxu1 (%p818_p11), %v2497_v0 }
 0x60b   : > { %820 = sbr.rel (!%p818_p11) target bundleno = 798 (0x31e), region = 205 }
 0x60e   : >> { %v931_v47 = vpop.f32.mrb[0].mxu1 }
 0x60f   : >> { %v937_v48 = vpack.c.bf16 %v931_v47, %v931_v47  ;;  %v1716_v49 = vpop.f32.mrb[1].mxu1 }
 0x610   : >> { %v934_v50 = vpop.f32.mrb[2].mxu1 }
 0x611   : >> { %940 = vst.msk [vmem:[%s939_s25] sm:$0xf] %vm747_vm2, %v937_v48  ;;  %v1717_v51 = vpop.f32.mrb[3].mxu1 }
 0x618   : > { %v942_v57 = vld [vmem:[#allocation5] sm:$0xf]  ;;  %v1000_v58 = vld [vmem:[#allocation5 + $0x4] sm:$0xf]  ;;  %v1050_v62 = vld [vmem:[#allocation5 + $0x8] sm:$0xf] }
 0x619   : > { %1721 = vmatmul.mubr.msk.bf16.vlgmr.msra.gmra.mrb[0].mxu0 %vm831_vm4, %v942_v57  ;;  %1727 = vmatmul.mubr.msk.bf16.vlgmr.msra.gmra.mrb[0].mxu1 %vm831_vm4, %v1000_v58  ;;  %v1100_v63 = vld [vmem:[#allocation5 + $0xc] sm:$0xf] }
 0x61a   : > { %1731 = vmatpush3.bf16.msra.mxu0 %v1056_v60  ;;  %1737 = vmatpush3.bf16.msra.mxu1 %v1106_v61 }
 0x61b   : > { %1732 = vmatprep.mubr.msk.bf16.mxu0 %vm2498_vm0, %v2497_v0  ;;  %1738 = vmatprep.mubr.msk.bf16.mxu1 %vm2498_vm0, %v2497_v0 }
 0x61c   : > { %1742 = vmatprep.subr.bf16.mxu0 %v2497_v0  ;;  %1750 = vmatprep.subr.bf16.mxu1 %v2497_v0 }
 0x621   : > { %1733 = vmatmul.mubr.msk.bf16.vlgmr.msra.gmra.mrb[4].mxu0 %vm831_vm4, %v1050_v62  ;;  %1739 = vmatmul.mubr.msk.bf16.vlgmr.msra.gmra.mrb[4].mxu1 %vm831_vm4, %v1100_v63 }
 0x622   : > { %1746 = vmatprep.mubr.msk.bf16.mxu0 %vm2498_vm0, %v2497_v0  ;;  %1758 = vmatprep.mubr.msk.bf16.mxu1 %vm2498_vm0, %v2497_v0 }
 0x623   : > { %1743 = vmatpush3.bf16.msra.mxu0 %v1965_v31  ;;  %1751 = vmatpush3.bf16.msra.mxu1 %v1967_v41 }
 0x624   : > { %1744 = vmatprep.subr.bf16.mxu0 %v2497_v0  ;;  %1752 = vmatprep.subr.bf16.mxu1 %v2497_v0 }
 0x627   : > { %1745 = vmatpush3.bf16.msra.mxu0 %v1966_v32  ;;  %1753 = vmatpush3.bf16.msra.mxu1 %v1968_v42 }
 0x628   : > { %1754 = vmatprep.subr.bf16.mxu1 %v2497_v0 }
 0x62b   : > { %1755 = vmatpush3.bf16.msra.mxu1 %v1969_v43 }
 0x62c   : > { %1756 = vmatprep.subr.bf16.mxu1 %v2497_v0  ;;  %v1661_v0 = vld [vmem:[#allocation24] ss:$0 sm:$0xff] }
 0x62f   : > { %1757 = vmatpush3.bf16.msra.mxu1 %v1970_v44 }
 0x6ec   : > { %v986_v2 = vpop.f32.mrb[0].mxu0  ;;  %v1042_v4 = vpop.f32.mrb[0].mxu1 }
 0x6ed   : > { %v998_v6 = vadd.f32 %v1651_v1, %v986_v2  ;;  %v1722_v7 = vpop.f32.mrb[1].mxu0  ;;  %v1728_v8 = vpop.f32.mrb[1].mxu1 }
 0x6ee   : > { %v989_v9 = vpop.f32.mrb[2].mxu0  ;;  %v1045_v10 = vpop.f32.mrb[2].mxu1 }
 0x6ef   : > { %v1048_v11 = vadd.f32 %v1042_v4, %v998_v6  ;;  %v1723_v12 = vpop.f32.mrb[3].mxu0  ;;  %v1729_v13 = vpop.f32.mrb[3].mxu1 }
 0x6f4   : > { %v1092_v14 = vpop.f32.mrb[4].mxu0  ;;  %v1142_v15 = vpop.f32.mrb[4].mxu1 }
 0x6f5   : > { %v1098_v16 = vadd.f32 %v1092_v14, %v1048_v11  ;;  %v1734_v17 = vpop.f32.mrb[5].mxu0  ;;  %v1740_v18 = vpop.f32.mrb[5].mxu1 }
 0x6f6   : > { %v1095_v19 = vpop.f32.mrb[6].mxu0  ;;  %v1145_v20 = vpop.f32.mrb[6].mxu1  ;;  %v1668_v18 = vld [vmem:[#allocation27] ss:$0 sm:$0xff] }
 0x6f7   : > { %v1148_v21 = vadd.f32 %v1142_v15, %v1098_v16  ;;  %v1735_v22 = vpop.f32.mrb[7].mxu0  ;;  %v1741_v23 = vpop.f32.mrb[7].mxu1  ;;  %v1667_v16 = vld [vmem:[#allocation26] ss:$0 sm:$0xff] }
 0x6f9   : > { %v1149_v24 = vadd.f32 %v1148_v21, %v677_v5 }
 0x6fb   : > { %v1152_v25 = vsel %vm701_vm1, %v1149_v24, 0.0 }
 0x6fc   : > { %1153 = vadd.xlane.f32.xlu0 %v1152_v25 }
 0x789   : > { %v1154_v26 = vpop.xlane.xlu0 %1153 }
 0x78a   : > { %v1156_v27 = vmul.f32 0.03125, %v1154_v26 }
 0x78c   : > { %v1157_v28 = vsub.f32 %v1149_v24, %v1156_v27 }
 0x78e   : > { %v1158_v29 = vmul.f32 %v1157_v28, %v1157_v28 }
 0x790   : > { %v1159_v30 = vsel %vm701_vm1, %v1158_v29, 0.0 }
 0x791   : > { %1160 = vadd.xlane.f32.xlu0 %v1159_v30 }
 0x81e   : > { %v1161_v33 = vpop.xlane.xlu0 %1160 }
 0x81f   : > { %v1162_v34 = vmul.f32 0.03125, %v1161_v33 }
 0x821   : > { %v1163_v3 = vadd.f32 1e-12, %v1162_v34 }
 0x823   : > { %1971 = vrsqrt.f32 %v1163_v3 }
 0x82d   : > { %v1972_v5 = vpop.eup %1971 }
 0x82e   : > { %v1165_v36 = vmul.f32 %v1972_v5, %v1157_v28 }
 0x830   : > { %v1172_v38 = vmul.f32 %v1655_v35, %v1165_v36 }
 0x832   : > { %v1179_v39 = vadd.f32 %v1656_v37, %v1172_v38 }
 0x834   : > { %v1180_v40 = vpack.c.bf16 %v1179_v39, %v1179_v39 }
 0x836   : > { %1747 = vmatmul.mubr.msk.bf16.vlgmr.msra.gmra.mrb[8].mxu0 %vm701_vm1, %v1180_v40 }
 0x909   : > { %v1241_v46 = vpop.f32.mrb[8].mxu0 }
 0x90a   : > { %v1242_v47 = vadd.f32 %v1657_v45, %v1241_v46  ;;  %v1748_v48 = vpop.f32.mrb[9].mxu0 }
 0x90b   : > { %v1244_v49 = vpop.f32.mrb[10].mxu0 }
 0x90c   : > { %v1248_v50 = vmul.f32 0.044715, %v1242_v47  ;;  %v1749_v51 = vpop.f32.mrb[11].mxu0  ;;  %v1247_v57 = vmul.f32 0.5, %v1242_v47 }
 0x90e   : > { %v1249_v52 = vmul.f32 %v1248_v50, %v1242_v47 }
 0x910   : > { %v1250_v53 = vmul.f32 %v1249_v52, %v1242_v47 }
 0x912   : > { %v1251_v54 = vadd.f32 %v1250_v53, %v1242_v47 }
 0x914   : > { %v1252_v55 = vmul.f32 0.7978846, %v1251_v54 }
 0x916   : > { %1973 = vtanh.f32 %v1252_v55 }
 0x920   : > { %v1974_v56 = vpop.eup %1973 }
 0x921   : > { %v1254_v58 = vadd.f32 1.0, %v1974_v56 }
 0x923   : > { %v1255_v59 = vmul.f32 %v1254_v58, %v1247_v57 }
 0x925   : > { %v1256_v60 = vpack.c.bf16 %v1255_v59, %v1255_v59 }
 0x927   : > { %1759 = vmatmul.mubr.msk.bf16.vlgmr.msra.gmra.mrb[8].mxu1 %vm1296_vm6, %v1256_v60 }
 0x9fa   : > { %v1334_v61 = vpop.f32.mrb[8].mxu1 }
 0x9fb   : > { %v1335_v62 = vadd.f32 %v1661_v0, %v1334_v61  ;;  %v1760_v63 = vpop.f32.mrb[9].mxu1 }
 0x9fc   : > { %v1337_v1 = vpop.f32.mrb[10].mxu1 }
 0x9fd   : > { %v1761_v2 = vpop.f32.mrb[11].mxu1  ;;  %v1340_v4 = vadd.f32 %v1335_v62, %v1179_v39 }
 0x9ff   : > { %v1343_v6 = vsel %vm701_vm1, %v1340_v4, 0.0 }
 0xa00   : > { %1344 = vadd.xlane.f32.xlu1 %v1343_v6 }
 0xa8d   : > { %v1345_v7 = vpop.xlane.xlu1 %1344 }
 0xa8e   : > { %v1346_v8 = vmul.f32 0.03125, %v1345_v7 }
 0xa90   : > { %v1347_v9 = vsub.f32 %v1340_v4, %v1346_v8 }
 0xa92   : > { %v1348_v10 = vmul.f32 %v1347_v9, %v1347_v9 }
 0xa94   : > { %v1349_v11 = vsel %vm701_vm1, %v1348_v10, 0.0 }
 0xa95   : > { %1350 = vadd.xlane.f32.xlu1 %v1349_v11 }
 0xb22   : > { %v1351_v12 = vpop.xlane.xlu1 %1350 }
 0xb23   : > { %v1352_v13 = vmul.f32 0.03125, %v1351_v12 }
 0xb25   : > { %v1353_v14 = vadd.f32 1e-12, %v1352_v13 }
 0xb27   : > { %1975 = vrsqrt.f32 %v1353_v14 }
 0xb31   : > { %v1976_v15 = vpop.eup %1975 }
 0xb32   : > { %v1355_v17 = vmul.f32 %v1976_v15, %v1347_v9 }
 0xb34   : > { %v1362_v19 = vmul.f32 %v1667_v16, %v1355_v17 }
 0xb36   : > { %v1369_v20 = vadd.f32 %v1668_v18, %v1362_v19 }
 0xb38   : > { %v1370_v21 = vpack.c.bf16 %v1369_v20, %v1369_v20 }
 0xb3a   : > { %1372 = vst.msk [vmem:[%s3064_s1] sm:$0xf] %vm1371_vm7, %v1370_v21 }
 0xb3b   : > { %2386 = shalt.err (!%p2383_p4)
}
 0xb3c   : > { %s2387_s3 = scalar_lea.hbm %s3131_s26, 64  ;;  %s2391_s19 = scalar_lea.hbm %s3254_s0, 128 }
 0xb3d   : > { %p2388_p10 = scmp.ne.s32.totalorder %s3131_s26, %s2387_s3  ;;  %p2392_p0 = scmp.lt.u32.totalorder %s3131_s26, %s3254_s0 }
 0xb3e   : > { %p2393_p6 = scmp.lt.u32.totalorder %s2391_s19, %s2387_s3  ;;  %p2395_p8 = scmp.lt.u32.totalorder %s2387_s3, %s3131_s26 }
 0xb3f   : > { %p2389_p5 = pnand %p2388_p10, %p3255_p9 }
 0xb40   : > { %p2394_p11 = por %p2393_p6, %p2392_p0 }
 0xb41   : > { %p2390_p7 = pneg %p2389_p5 }
 0xb42   : > { %p2396_p12 = por %p2395_p8, %p2394_p11 }
 0xb44   : > { %p2397_p13 = pnand %p2396_p12, %p2390_p7 }
 0xb46   : > { %2400 = shalt.err (!%p2397_p13)
}
 0xb47   : > { %1814 = dma.vmem_to_hbm [thread:$0]  (%p3255_p9), %s3133_s6, 64, %s3131_s26, %s1374_s18  }
 0xb48 PF: > { %s3256_s4 = sld [smem:[#allocation40_spill]]  ;;  %p3257_p1 = scmp.ne.s32.totalorder %s3230_s17, 0 }
 0xb49   : > { %p3258_p3 = scmp.ge.s32.totalorder %s2475_s16, 2 }
 0xb4b   : > { %p1861_p2 = pnand %p3258_p3, %p3257_p1 }
 0xb4e   : > { %s1399_s28 = sand.u32 1, %s3256_s4  }
 0xb4f   : > { %s1400_s27 = scalar_lea.sflag [#allocation8], %s1399_s28 }
 0xb50   : > { %2458 = dma.done.wait (!%p1861_p2), %s1400_s27, 64  }
 0xb51   : > { %2460 = vsyncadd (!%p1861_p2), %s1400_s27, 4294967232  ;;  %p36_p4 = scmp.ge.s32.totalorder %s2886_s23, 4   ;;  %s3259_s29 = smov %s2467_s30 }
 0xb52   : > { %s3260_s30 = smov %s2471_s15  ;;  %s3261_s15 = smov %s2897_s2 }
 0xb53   : > { %s3262_s16 = smov %s2886_s23  ;;  %38 = sbr.rel (!%p36_p4) target bundleno = 22 (0x16), region = 216 }
 0xb5a   :  { %1405 = vsyncpa [#allocation7], 1 }
 0xb5b   :  { %1407 = vsyncpa [#allocation7 + $0x1], 1 }
 0xb5c   :  { %1408 = vsyncpa [#allocation10], 1 }
 0xb5d   :  { %1410 = vsyncpa [#allocation10 + $0x1], 1 }
 0xb5e   :  { %1411 = vsyncpa [#allocation13], 1 }
 0xb5f   :  { %1412 = vsyncpa [#allocation16], 1 }
 0xb60   :  { %1413 = vsyncpa [#allocation19], 1 }
 0xb61   :  { %1414 = vsyncpa [#allocation22], 1 }
 0xb62   :  { %1415 = vsyncpa [#allocation25], 1 }
 0xb63   :  { %1416 = vsyncpa [#allocation28], 1 }
 0xb64   :  { %1417 = vsyncpa [#allocation8], 1 }
 0xb65   :  { %1419 = vsyncpa [#allocation8 + $0x1], 1 }

</bundles_post_ra>
